<compile_context>
chip_gen: v7x
topology: tpu7x:2x2x1
jax: 0.10.0
libtpu: 0.0.40
codegen_flags: <defaults>
</compile_context>

<pallas_src>
import jax
import jax.numpy as jnp
import numpy as np
from jax import lax
from jax.experimental import pallas as pl
from jax.experimental.pallas import tpu as pltpu

# ---------------- model dimensions (small demo sizes) ----------------
B, T, F = 2, 8, 32       # batch, time, model dim
BT = B * T               # flattened batch*time
HID = 128                # feed-forward hidden dim
H = 4                    # attention heads
DH = F // H              # head dim
K = 7                    # depthwise conv kernel size
PAD = (K - 1) // 2
EPS = 1e-5


# ---------------- small helpers usable both in- and out-of-kernel ------------
def _layernorm(x, g, b):
    mu = jnp.mean(x, axis=-1, keepdims=True)
    var = jnp.mean(jnp.square(x - mu), axis=-1, keepdims=True)
    return (x - mu) * lax.rsqrt(var + EPS) * g + b


def _silu(x):
    return x * jax.nn.sigmoid(x)


# ---------------- fused Pallas kernel ----------------
def conformer_block_kernel(
        x_ref, bias_ref,
        # ff_1: LN gamma/beta, linear_ff W/b, linear_out W/b
        f1g_ref, f1b_ref, f1w1_ref, f1b1_ref, f1w2_ref, f1b2_ref,
        # conv: LN, pointwise_conv1 value/gate halves, depthwise W/b,
        #       BN gamma/beta/mean/var, pointwise_conv2 W/b
        cg_ref, cb_ref, cw1a_ref, cb1a_ref, cw1b_ref, cb1b_ref,
        cwdw_ref, cbdw_ref, bng_ref, bnb_ref, bnm_ref, bnv_ref,
        cw2_ref, cb2_ref,
        # mhsa: LN, fused Wqkv (F, 3F) / bqkv, Wout (F, F) / bout
        mg_ref, mb_ref, wqkv_ref, bqkv_ref, wo_ref, bo_ref,
        # ff_2
        f2g_ref, f2b_ref, f2w1_ref, f2b1_ref, f2w2_ref, f2b2_ref,
        # final layer norm
        fg_ref, fb_ref,
        o_ref):
    x = x_ref[...]                                            # (BT, F)
    bias = bias_ref[...]                                      # (BT, BT) additive attn bias

    # ---------- ff_1 : residual = 0.5 * FF(x) + x ----------
    h = _layernorm(x, f1g_ref[...], f1b_ref[...])
    h = _silu(jnp.dot(h, f1w1_ref[...], preferred_element_type=jnp.float32)
              + f1b1_ref[...])                                # dropout: identity
    y = jnp.dot(h, f1w2_ref[...], preferred_element_type=jnp.float32) + f1b2_ref[...]
    r = 0.5 * y + x

    # ---------- conv module : residual = Conv(r) + r ----------
    h = _layernorm(r, cg_ref[...], cb_ref[...])
    # GLU's Linear(F -> 2F) split into value/gate halves (mathematically identical).
    a = jnp.dot(h, cw1a_ref[...], preferred_element_type=jnp.float32) + cb1a_ref[...]
    g = jnp.dot(h, cw1b_ref[...], preferred_element_type=jnp.float32) + cb1b_ref[...]
    h = a * jax.nn.sigmoid(g)
    # Depthwise conv along time (PyTorch Conv1d, groups=channels, padding=PAD),
    # realised as K static sublane rotations (XLU) + per-batch boundary masks
    # (row % T) so the flattened batch never leaks across batch boundaries.
    row = lax.broadcasted_iota(jnp.int32, (BT, 1), 0)
    row_in_batch = row % T
    acc = None
    for k in range(K):
        s = PAD - k                                           # out[t] uses h[t - s]
        if s == 0:
            tap = h * cwdw_ref[k:k + 1, :]
        else:
            shifted = pltpu.roll(h, shift=s % BT, axis=0)     # circular shift over BT rows
            valid = jnp.logical_and(row_in_batch >= s, row_in_batch < T + s)
            tap = jnp.where(valid, shifted, 0.0) * cwdw_ref[k:k + 1, :]
        acc = tap if acc is None else acc + tap
    h = acc + cbdw_ref[...]
    # BatchNorm1d in eval mode (running stats)
    h = (h - bnm_ref[...]) * lax.rsqrt(bnv_ref[...] + EPS) * bng_ref[...] + bnb_ref[...]
    h = _silu(h)
    r = jnp.dot(h, cw2_ref[...], preferred_element_type=jnp.float32) + cb2_ref[...] + r

    # ---------- mhsa : residual = MHSA(r) + r ----------
    h = _layernorm(r, mg_ref[...], mb_ref[...])
    qkv = jnp.dot(h, wqkv_ref[...], preferred_element_type=jnp.float32) + bqkv_ref[...]
    scale = 1.0 / (DH ** 0.5)
    heads = []
    for hh in range(H):
        q = qkv[:, hh * DH:(hh + 1) * DH]                     # (BT, DH)
        kk = qkv[:, F + hh * DH:F + (hh + 1) * DH]
        v = qkv[:, 2 * F + hh * DH:2 * F + (hh + 1) * DH]
        sc = lax.dot_general(q, kk, (((1,), (1,)), ((), ())),
                             preferred_element_type=jnp.float32) * scale + bias
        m = jnp.max(sc, axis=-1, keepdims=True)
        p = jnp.exp(sc - m)
        p = p * pl.reciprocal(jnp.sum(p, axis=-1, keepdims=True), approx=True)
        heads.append(jnp.dot(p, v, preferred_element_type=jnp.float32))   # (BT, DH)
    att = jnp.concatenate(heads, axis=-1)                     # (BT, F)
    r = jnp.dot(att, wo_ref[...], preferred_element_type=jnp.float32) + bo_ref[...] + r

    # ---------- ff_2 : x = 0.5 * FF(r) + r ----------
    h = _layernorm(r, f2g_ref[...], f2b_ref[...])
    h = _silu(jnp.dot(h, f2w1_ref[...], preferred_element_type=jnp.float32)
              + f2b1_ref[...])
    y = jnp.dot(h, f2w2_ref[...], preferred_element_type=jnp.float32) + f2b2_ref[...]
    r = 0.5 * y + r

    # ---------- final LayerNorm ----------
    o_ref[...] = _layernorm(r, fg_ref[...], fb_ref[...])


# ---------------- pallas_call wrapper ----------------
def conformer_block(x, key_padding_mask, params):
    """Pallas implementation of ConformerBlockV1.forward (eval mode)."""
    ff1, conv, mhsa, ff2, fln = params
    flat = list(ff1) + list(conv) + list(mhsa) + list(ff2) + list(fln)

    # Flatten batch*time; build the (BT, BT) additive attention bias:
    # block-diagonal over batches + key padding (True => key masked out).
    x2 = x.reshape(BT, F)
    batch_of = jnp.arange(BT, dtype=jnp.int32) // T
    same_batch = batch_of[:, None] == batch_of[None, :]
    key_valid = jnp.logical_not(key_padding_mask.reshape(BT))
    bias = jnp.where(same_batch & key_valid[None, :], 0.0, -1e30).astype(jnp.float32)

    def full_spec(arr):
        zeros = (0,) * arr.ndim
        return pl.BlockSpec(arr.shape, lambda *_, z=zeros: z)

    out = pl.pallas_call(
        conformer_block_kernel,
        out_shape=jax.ShapeDtypeStruct((BT, F), jnp.float32),
        in_specs=[full_spec(x2), full_spec(bias)] + [full_spec(a) for a in flat],
        out_specs=full_spec(x2),
    )(x2, bias, *flat)
    return out.reshape(B, T, F)


# ---------------- deterministic parameter init ----------------
def init_params(key):
    ks = iter(jax.random.split(key, 64))

    def n(shape, scale=0.05):
        return (scale * jax.random.normal(next(ks), shape)).astype(jnp.float32)

    def ones(shape):
        return jnp.ones(shape, jnp.float32)

    def ff_params():
        return (ones((1, F)) + n((1, F), 0.01), n((1, F), 0.01),   # LN gamma, beta
                n((F, HID)), n((1, HID)),                          # linear_ff
                n((HID, F)), n((1, F)))                            # linear_out

    ff1 = ff_params()
    ff2 = ff_params()
    conv = (ones((1, F)) + n((1, F), 0.01), n((1, F), 0.01),       # LN
            n((F, F)), n((1, F)),                                  # pointwise_conv1 (value half)
            n((F, F)), n((1, F)),                                  # pointwise_conv1 (gate half)
            n((K, F)), n((1, F)),                                  # depthwise conv w, b
            ones((1, F)) + n((1, F), 0.01), n((1, F), 0.01),       # BN gamma, beta
            n((1, F), 0.02), ones((1, F)) + jnp.abs(n((1, F), 0.05)),  # BN mean, var
            n((F, F)), n((1, F)))                                  # pointwise_conv2
    mhsa = (ones((1, F)) + n((1, F), 0.01), n((1, F), 0.01),       # LN
            n((F, 3 * F)), n((1, 3 * F)),                          # fused Wqkv, bqkv
            n((F, F)), n((1, F)))                                  # Wout, bout
    fln = (ones((1, F)) + n((1, F), 0.01), n((1, F), 0.01))
    return ff1, conv, mhsa, ff2, fln


# ---------------- pure-JAX reference (for numerical sanity check) ----------------
def _ref_block(x, mask, params):
    PH = lax.Precision.HIGHEST
    ff1, conv, mhsa, ff2, fln = params

    def ff(t, p):
        g, b, w1, b1, w2, b2 = p
        h = _layernorm(t, g, b)
        h = _silu(jnp.dot(h, w1, precision=PH) + b1)
        return jnp.dot(h, w2, precision=PH) + b2

    def conv_mod(t, p):
        g, b, w1a, b1a, w1b, b1b, wdw, bdw, bng, bnb, bnm, bnv, w2, b2 = p
        h = _layernorm(t, g, b)
        a = jnp.dot(h, w1a, precision=PH) + b1a
        gg = jnp.dot(h, w1b, precision=PH) + b1b
        h = a * jax.nn.sigmoid(gg)
        padded = jnp.pad(h, ((0, 0), (PAD, PAD), (0, 0)))
        acc = jnp.zeros_like(h) + bdw
        for k in range(K):
            acc = acc + padded[:, k:k + T, :] * wdw[k]
        h = (acc - bnm) * lax.rsqrt(bnv + EPS) * bng + bnb
        h = _silu(h)
        return jnp.dot(h, w2, precision=PH) + b2

    def mhsa_mod(t, bias, p):
        g, b, wqkv, bqkv, wo, bo = p
        h = _layernorm(t, g, b)
        qkv = jnp.einsum("btf,fe->bte", h, wqkv, precision=PH) + bqkv
        q = qkv[..., :F].reshape(B, T, H, DH)
        k = qkv[..., F:2 * F].reshape(B, T, H, DH)
        v = qkv[..., 2 * F:].reshape(B, T, H, DH)
        s = jnp.einsum("bqhd,bkhd->bhqk", q, k, precision=PH) / jnp.sqrt(DH)
        s = s + bias[:, None, :, :]
        p_att = jax.nn.softmax(s, axis=-1)
        o = jnp.einsum("bhqk,bkhd->bqhd", p_att, v, precision=PH).reshape(B, T, F)
        return jnp.einsum("btf,fe->bte", o, wo, precision=PH) + bo

    bias = jnp.where(mask, -1e30, 0.0).astype(jnp.float32)[:, None, :]
    r = x
    r = 0.5 * ff(r, ff1) + r
    r = conv_mod(r, conv) + r
    r = mhsa_mod(r, bias, mhsa) + r
    r = 0.5 * ff(r, ff2) + r
    return _layernorm(r, fln[0], fln[1])


if __name__ == "__main__":
    key = jax.random.PRNGKey(0)
    kx, kp = jax.random.split(key)
    x = jax.random.normal(kx, (B, T, F), jnp.float32)
    # key_padding_mask: True = padded key position (batch 1 has 3 padded frames)
    lengths = jnp.array([T, T - 3], dtype=jnp.int32)
    key_padding_mask = jnp.arange(T)[None, :] >= lengths[:, None]

    params = init_params(kp)

    out = conformer_block(x, key_padding_mask, params)
    out = jax.block_until_ready(out)
    assert out.shape == (B, T, F)

    ref = _ref_block(x, key_padding_mask, params)
    np.testing.assert_allclose(np.asarray(out), np.asarray(ref), rtol=1e-2, atol=1e-2)

    print("KERNEL_OK")
</pallas_src>

<mosaic_0001>
module attributes {stable_mosaic.version = 11 : i64} {
  func.func @conformer_block_kernel(%arg0: memref<16x32xf32, #tpu.memory_space<vmem>>, %arg1: memref<16x16xf32, #tpu.memory_space<vmem>>, %arg2: memref<1x32xf32, #tpu.memory_space<vmem>>, %arg3: memref<1x32xf32, #tpu.memory_space<vmem>>, %arg4: memref<32x128xf32, #tpu.memory_space<vmem>>, %arg5: memref<1x128xf32, #tpu.memory_space<vmem>>, %arg6: memref<128x32xf32, #tpu.memory_space<vmem>>, %arg7: memref<1x32xf32, #tpu.memory_space<vmem>>, %arg8: memref<1x32xf32, #tpu.memory_space<vmem>>, %arg9: memref<1x32xf32, #tpu.memory_space<vmem>>, %arg10: memref<32x32xf32, #tpu.memory_space<vmem>>, %arg11: memref<1x32xf32, #tpu.memory_space<vmem>>, %arg12: memref<32x32xf32, #tpu.memory_space<vmem>>, %arg13: memref<1x32xf32, #tpu.memory_space<vmem>>, %arg14: memref<7x32xf32, #tpu.memory_space<vmem>>, %arg15: memref<1x32xf32, #tpu.memory_space<vmem>>, %arg16: memref<1x32xf32, #tpu.memory_space<vmem>>, %arg17: memref<1x32xf32, #tpu.memory_space<vmem>>, %arg18: memref<1x32xf32, #tpu.memory_space<vmem>>, %arg19: memref<1x32xf32, #tpu.memory_space<vmem>>, %arg20: memref<32x32xf32, #tpu.memory_space<vmem>>, %arg21: memref<1x32xf32, #tpu.memory_space<vmem>>, %arg22: memref<1x32xf32, #tpu.memory_space<vmem>>, %arg23: memref<1x32xf32, #tpu.memory_space<vmem>>, %arg24: memref<32x96xf32, #tpu.memory_space<vmem>>, %arg25: memref<1x96xf32, #tpu.memory_space<vmem>>, %arg26: memref<32x32xf32, #tpu.memory_space<vmem>>, %arg27: memref<1x32xf32, #tpu.memory_space<vmem>>, %arg28: memref<1x32xf32, #tpu.memory_space<vmem>>, %arg29: memref<1x32xf32, #tpu.memory_space<vmem>>, %arg30: memref<32x128xf32, #tpu.memory_space<vmem>>, %arg31: memref<1x128xf32, #tpu.memory_space<vmem>>, %arg32: memref<128x32xf32, #tpu.memory_space<vmem>>, %arg33: memref<1x32xf32, #tpu.memory_space<vmem>>, %arg34: memref<1x32xf32, #tpu.memory_space<vmem>>, %arg35: memref<1x32xf32, #tpu.memory_space<vmem>>, %arg36: memref<16x32xf32, #tpu.memory_space<vmem>>) attributes {dimension_semantics = [], scalar_prefetch = 0 : i64, scratch_operands = 0 : i64, tpu.core_type = #tpu.core_type<tc>} {
    %c0 = arith.constant 0 : index
    %c0_0 = arith.constant 0 : index
    %0 = vector.load %arg0[%c0, %c0_0] : memref<16x32xf32, #tpu.memory_space<vmem>>, vector<16x32xf32>
    %c0_1 = arith.constant 0 : index
    %c0_2 = arith.constant 0 : index
    %1 = vector.load %arg1[%c0_1, %c0_2] : memref<16x16xf32, #tpu.memory_space<vmem>>, vector<16x16xf32>
    %c0_3 = arith.constant 0 : index
    %c0_4 = arith.constant 0 : index
    %2 = vector.load %arg2[%c0_3, %c0_4] : memref<1x32xf32, #tpu.memory_space<vmem>>, vector<1x32xf32>
    %c0_5 = arith.constant 0 : index
    %c0_6 = arith.constant 0 : index
    %3 = vector.load %arg3[%c0_5, %c0_6] : memref<1x32xf32, #tpu.memory_space<vmem>>, vector<1x32xf32>
    %cst = arith.constant dense<0.000000e+00> : vector<16xf32>
    %4 = vector.multi_reduction <add>, %0, %cst [1] : vector<16x32xf32> to vector<16xf32>
    %5 = vector.shape_cast %4 : vector<16xf32> to vector<16x1xf32>
    %cst_7 = arith.constant 3.200000e+01 : f32
    %6 = vector.broadcast %cst_7 : f32 to vector<16x1xf32>
    %7 = arith.divf %5, %6 : vector<16x1xf32>
    %8 = vector.broadcast %7 : vector<16x1xf32> to vector<16x32xf32>
    %9 = arith.subf %0, %8 : vector<16x32xf32>
    %10 = arith.mulf %9, %9 : vector<16x32xf32>
    %cst_8 = arith.constant dense<0.000000e+00> : vector<16xf32>
    %11 = vector.multi_reduction <add>, %10, %cst_8 [1] : vector<16x32xf32> to vector<16xf32>
    %12 = vector.shape_cast %11 : vector<16xf32> to vector<16x1xf32>
    %cst_9 = arith.constant 3.200000e+01 : f32
    %13 = vector.broadcast %cst_9 : f32 to vector<16x1xf32>
    %14 = arith.divf %12, %13 : vector<16x1xf32>
    %15 = vector.broadcast %7 : vector<16x1xf32> to vector<16x32xf32>
    %16 = arith.subf %0, %15 : vector<16x32xf32>
    %cst_10 = arith.constant 9.99999974E-6 : f32
    %17 = vector.broadcast %cst_10 : f32 to vector<16x1xf32>
    %18 = arith.addf %14, %17 : vector<16x1xf32>
    %19 = math.rsqrt %18 : vector<16x1xf32>
    %20 = vector.broadcast %19 : vector<16x1xf32> to vector<16x32xf32>
    %21 = arith.mulf %16, %20 : vector<16x32xf32>
    %22 = vector.broadcast %2 : vector<1x32xf32> to vector<16x32xf32>
    %23 = arith.mulf %21, %22 : vector<16x32xf32>
    %24 = vector.broadcast %3 : vector<1x32xf32> to vector<16x32xf32>
    %25 = arith.addf %23, %24 : vector<16x32xf32>
    %c0_11 = arith.constant 0 : index
    %c0_12 = arith.constant 0 : index
    %26 = vector.load %arg4[%c0_11, %c0_12] : memref<32x128xf32, #tpu.memory_space<vmem>>, vector<32x128xf32>
    %cst_13 = arith.constant dense<0.000000e+00> : vector<16x128xf32>
    %27 = tpu.matmul %25, %26, %cst_13 {dimension_numbers = #tpu.dot_dimension_numbers<[1], [0], [0], [1], [0, 0, 1, 1], [], []>} : vector<16x32xf32>, vector<32x128xf32>, vector<16x128xf32> -> vector<16x128xf32>
    %c0_14 = arith.constant 0 : index
    %c0_15 = arith.constant 0 : index
    %28 = vector.load %arg5[%c0_14, %c0_15] : memref<1x128xf32, #tpu.memory_space<vmem>>, vector<1x128xf32>
    %29 = vector.broadcast %28 : vector<1x128xf32> to vector<16x128xf32>
    %30 = arith.addf %27, %29 : vector<16x128xf32>
    %31 = arith.negf %30 : vector<16x128xf32>
    %32 = math.exp %31 : vector<16x128xf32>
    %cst_16 = arith.constant 1.000000e+00 : f32
    %33 = vector.broadcast %cst_16 : f32 to vector<16x128xf32>
    %34 = arith.addf %33, %32 : vector<16x128xf32>
    %35 = arith.divf %33, %34 : vector<16x128xf32>
    %36 = arith.mulf %30, %35 : vector<16x128xf32>
    %c0_17 = arith.constant 0 : index
    %c0_18 = arith.constant 0 : index
    %37 = vector.load %arg6[%c0_17, %c0_18] : memref<128x32xf32, #tpu.memory_space<vmem>>, vector<128x32xf32>
    %cst_19 = arith.constant dense<0.000000e+00> : vector<16x32xf32>
    %38 = tpu.matmul %36, %37, %cst_19 {dimension_numbers = #tpu.dot_dimension_numbers<[1], [0], [0], [1], [0, 0, 1, 1], [], []>} : vector<16x128xf32>, vector<128x32xf32>, vector<16x32xf32> -> vector<16x32xf32>
    %c0_20 = arith.constant 0 : index
    %c0_21 = arith.constant 0 : index
    %39 = vector.load %arg7[%c0_20, %c0_21] : memref<1x32xf32, #tpu.memory_space<vmem>>, vector<1x32xf32>
    %40 = vector.broadcast %39 : vector<1x32xf32> to vector<16x32xf32>
    %41 = arith.addf %38, %40 : vector<16x32xf32>
    %cst_22 = arith.constant 5.000000e-01 : f32
    %42 = vector.broadcast %cst_22 : f32 to vector<16x32xf32>
    %43 = arith.mulf %42, %41 : vector<16x32xf32>
    %44 = arith.addf %43, %0 : vector<16x32xf32>
    %c0_23 = arith.constant 0 : index
    %c0_24 = arith.constant 0 : index
    %45 = vector.load %arg8[%c0_23, %c0_24] : memref<1x32xf32, #tpu.memory_space<vmem>>, vector<1x32xf32>
    %c0_25 = arith.constant 0 : index
    %c0_26 = arith.constant 0 : index
    %46 = vector.load %arg9[%c0_25, %c0_26] : memref<1x32xf32, #tpu.memory_space<vmem>>, vector<1x32xf32>
    %cst_27 = arith.constant dense<0.000000e+00> : vector<16xf32>
    %47 = vector.multi_reduction <add>, %44, %cst_27 [1] : vector<16x32xf32> to vector<16xf32>
    %48 = vector.shape_cast %47 : vector<16xf32> to vector<16x1xf32>
    %cst_28 = arith.constant 3.200000e+01 : f32
    %49 = vector.broadcast %cst_28 : f32 to vector<16x1xf32>
    %50 = arith.divf %48, %49 : vector<16x1xf32>
    %51 = vector.broadcast %50 : vector<16x1xf32> to vector<16x32xf32>
    %52 = arith.subf %44, %51 : vector<16x32xf32>
    %53 = arith.mulf %52, %52 : vector<16x32xf32>
    %cst_29 = arith.constant dense<0.000000e+00> : vector<16xf32>
    %54 = vector.multi_reduction <add>, %53, %cst_29 [1] : vector<16x32xf32> to vector<16xf32>
    %55 = vector.shape_cast %54 : vector<16xf32> to vector<16x1xf32>
    %cst_30 = arith.constant 3.200000e+01 : f32
    %56 = vector.broadcast %cst_30 : f32 to vector<16x1xf32>
    %57 = arith.divf %55, %56 : vector<16x1xf32>
    %58 = vector.broadcast %50 : vector<16x1xf32> to vector<16x32xf32>
    %59 = arith.subf %44, %58 : vector<16x32xf32>
    %cst_31 = arith.constant 9.99999974E-6 : f32
    %60 = vector.broadcast %cst_31 : f32 to vector<16x1xf32>
    %61 = arith.addf %57, %60 : vector<16x1xf32>
    %62 = math.rsqrt %61 : vector<16x1xf32>
    %63 = vector.broadcast %62 : vector<16x1xf32> to vector<16x32xf32>
    %64 = arith.mulf %59, %63 : vector<16x32xf32>
    %65 = vector.broadcast %45 : vector<1x32xf32> to vector<16x32xf32>
    %66 = arith.mulf %64, %65 : vector<16x32xf32>
    %67 = vector.broadcast %46 : vector<1x32xf32> to vector<16x32xf32>
    %68 = arith.addf %66, %67 : vector<16x32xf32>
    %c0_32 = arith.constant 0 : index
    %c0_33 = arith.constant 0 : index
    %69 = vector.load %arg10[%c0_32, %c0_33] : memref<32x32xf32, #tpu.memory_space<vmem>>, vector<32x32xf32>
    %cst_34 = arith.constant dense<0.000000e+00> : vector<16x32xf32>
    %70 = tpu.matmul %68, %69, %cst_34 {dimension_numbers = #tpu.dot_dimension_numbers<[1], [0], [0], [1], [0, 0, 1, 1], [], []>} : vector<16x32xf32>, vector<32x32xf32>, vector<16x32xf32> -> vector<16x32xf32>
    %c0_35 = arith.constant 0 : index
    %c0_36 = arith.constant 0 : index
    %71 = vector.load %arg11[%c0_35, %c0_36] : memref<1x32xf32, #tpu.memory_space<vmem>>, vector<1x32xf32>
    %72 = vector.broadcast %71 : vector<1x32xf32> to vector<16x32xf32>
    %73 = arith.addf %70, %72 : vector<16x32xf32>
    %c0_37 = arith.constant 0 : index
    %c0_38 = arith.constant 0 : index
    %74 = vector.load %arg12[%c0_37, %c0_38] : memref<32x32xf32, #tpu.memory_space<vmem>>, vector<32x32xf32>
    %cst_39 = arith.constant dense<0.000000e+00> : vector<16x32xf32>
    %75 = tpu.matmul %68, %74, %cst_39 {dimension_numbers = #tpu.dot_dimension_numbers<[1], [0], [0], [1], [0, 0, 1, 1], [], []>} : vector<16x32xf32>, vector<32x32xf32>, vector<16x32xf32> -> vector<16x32xf32>
    %c0_40 = arith.constant 0 : index
    %c0_41 = arith.constant 0 : index
    %76 = vector.load %arg13[%c0_40, %c0_41] : memref<1x32xf32, #tpu.memory_space<vmem>>, vector<1x32xf32>
    %77 = vector.broadcast %76 : vector<1x32xf32> to vector<16x32xf32>
    %78 = arith.addf %75, %77 : vector<16x32xf32>
    %79 = arith.negf %78 : vector<16x32xf32>
    %80 = math.exp %79 : vector<16x32xf32>
    %cst_42 = arith.constant 1.000000e+00 : f32
    %81 = vector.broadcast %cst_42 : f32 to vector<16x32xf32>
    %82 = arith.addf %81, %80 : vector<16x32xf32>
    %83 = arith.divf %81, %82 : vector<16x32xf32>
    %84 = arith.mulf %73, %83 : vector<16x32xf32>
    %85 = tpu.iota {dimensions = array<i32: 0>} : vector<16x1xi32>
    %c8_i32 = arith.constant 8 : i32
    %c0_i32 = arith.constant 0 : i32
    %86 = arith.cmpi eq, %c8_i32, %c0_i32 : i32
    %c1_i32 = arith.constant 1 : i32
    %87 = arith.select %86, %c1_i32, %c8_i32 : i32
    %88 = vector.broadcast %87 : i32 to vector<16x1xi32>
    %89 = arith.remsi %85, %88 : vector<16x1xi32>
    %c0_i32_43 = arith.constant 0 : i32
    %90 = vector.broadcast %c0_i32_43 : i32 to vector<16x1xi32>
    %91 = arith.cmpi ne, %89, %90 : vector<16x1xi32>
    %c0_i32_44 = arith.constant 0 : i32
    %92 = vector.broadcast %c0_i32_44 : i32 to vector<16x1xi32>
    %93 = arith.cmpi slt, %89, %92 : vector<16x1xi32>
    %c0_i32_45 = arith.constant 0 : i32
    %94 = arith.cmpi slt, %87, %c0_i32_45 : i32
    %95 = vector.broadcast %94 : i1 to vector<16x1xi1>
    %96 = vector.broadcast %95 : vector<16x1xi1> to vector<16x1xi1>
    %97 = arith.xori %93, %96 : vector<16x1xi1>
    %98 = arith.andi %97, %91 : vector<16x1xi1>
    %99 = vector.broadcast %87 : i32 to vector<16x1xi32>
    %100 = arith.addi %89, %99 : vector<16x1xi32>
    %101 = arith.select %98, %100, %89 : vector<16x1xi1>, vector<16x1xi32>
    %c3_i32 = arith.constant 3 : i32
    %102 = tpu.dynamic_rotate %84 by %c3_i32 dim 0 : vector<16x32xf32>, i32 -> vector<16x32xf32>
    %c3_i32_46 = arith.constant 3 : i32
    %103 = vector.broadcast %c3_i32_46 : i32 to vector<16x1xi32>
    %104 = arith.cmpi sge, %101, %103 : vector<16x1xi32>
    %c11_i32 = arith.constant 11 : i32
    %105 = vector.broadcast %c11_i32 : i32 to vector<16x1xi32>
    %106 = arith.cmpi slt, %101, %105 : vector<16x1xi32>
    %107 = arith.andi %104, %106 : vector<16x1xi1>
    %cst_47 = arith.constant 0.000000e+00 : f32
    %108 = vector.shape_cast %107 : vector<16x1xi1> to vector<16x1xi1>
    %109 = vector.broadcast %108 : vector<16x1xi1> to vector<16x32xi1>
    %110 = vector.broadcast %cst_47 : f32 to vector<16x32xf32>
    %111 = arith.select %109, %102, %110 : vector<16x32xi1>, vector<16x32xf32>
    %c0_48 = arith.constant 0 : index
    %c0_49 = arith.constant 0 : index
    %112 = vector.load %arg14[%c0_48, %c0_49] : memref<7x32xf32, #tpu.memory_space<vmem>>, vector<1x32xf32>
    %113 = vector.broadcast %112 : vector<1x32xf32> to vector<16x32xf32>
    %114 = arith.mulf %111, %113 : vector<16x32xf32>
    %c2_i32 = arith.constant 2 : i32
    %115 = tpu.dynamic_rotate %84 by %c2_i32 dim 0 : vector<16x32xf32>, i32 -> vector<16x32xf32>
    %c2_i32_50 = arith.constant 2 : i32
    %116 = vector.broadcast %c2_i32_50 : i32 to vector<16x1xi32>
    %117 = arith.cmpi sge, %101, %116 : vector<16x1xi32>
    %c10_i32 = arith.constant 10 : i32
    %118 = vector.broadcast %c10_i32 : i32 to vector<16x1xi32>
    %119 = arith.cmpi slt, %101, %118 : vector<16x1xi32>
    %120 = arith.andi %117, %119 : vector<16x1xi1>
    %cst_51 = arith.constant 0.000000e+00 : f32
    %121 = vector.shape_cast %120 : vector<16x1xi1> to vector<16x1xi1>
    %122 = vector.broadcast %121 : vector<16x1xi1> to vector<16x32xi1>
    %123 = vector.broadcast %cst_51 : f32 to vector<16x32xf32>
    %124 = arith.select %122, %115, %123 : vector<16x32xi1>, vector<16x32xf32>
    %c1 = arith.constant 1 : index
    %c0_52 = arith.constant 0 : index
    %125 = vector.load %arg14[%c1, %c0_52] : memref<7x32xf32, #tpu.memory_space<vmem>>, vector<1x32xf32>
    %126 = vector.broadcast %125 : vector<1x32xf32> to vector<16x32xf32>
    %127 = arith.mulf %124, %126 : vector<16x32xf32>
    %128 = arith.addf %114, %127 : vector<16x32xf32>
    %c1_i32_53 = arith.constant 1 : i32
    %129 = tpu.dynamic_rotate %84 by %c1_i32_53 dim 0 : vector<16x32xf32>, i32 -> vector<16x32xf32>
    %c1_i32_54 = arith.constant 1 : i32
    %130 = vector.broadcast %c1_i32_54 : i32 to vector<16x1xi32>
    %131 = arith.cmpi sge, %101, %130 : vector<16x1xi32>
    %c9_i32 = arith.constant 9 : i32
    %132 = vector.broadcast %c9_i32 : i32 to vector<16x1xi32>
    %133 = arith.cmpi slt, %101, %132 : vector<16x1xi32>
    %134 = arith.andi %131, %133 : vector<16x1xi1>
    %cst_55 = arith.constant 0.000000e+00 : f32
    %135 = vector.shape_cast %134 : vector<16x1xi1> to vector<16x1xi1>
    %136 = vector.broadcast %135 : vector<16x1xi1> to vector<16x32xi1>
    %137 = vector.broadcast %cst_55 : f32 to vector<16x32xf32>
    %138 = arith.select %136, %129, %137 : vector<16x32xi1>, vector<16x32xf32>
    %c2 = arith.constant 2 : index
    %c0_56 = arith.constant 0 : index
    %139 = vector.load %arg14[%c2, %c0_56] : memref<7x32xf32, #tpu.memory_space<vmem>>, vector<1x32xf32>
    %140 = vector.broadcast %139 : vector<1x32xf32> to vector<16x32xf32>
    %141 = arith.mulf %138, %140 : vector<16x32xf32>
    %142 = arith.addf %128, %141 : vector<16x32xf32>
    %c3 = arith.constant 3 : index
    %c0_57 = arith.constant 0 : index
    %143 = vector.load %arg14[%c3, %c0_57] : memref<7x32xf32, #tpu.memory_space<vmem>>, vector<1x32xf32>
    %144 = vector.broadcast %143 : vector<1x32xf32> to vector<16x32xf32>
    %145 = arith.mulf %84, %144 : vector<16x32xf32>
    %146 = arith.addf %142, %145 : vector<16x32xf32>
    %c15_i32 = arith.constant 15 : i32
    %147 = tpu.dynamic_rotate %84 by %c15_i32 dim 0 : vector<16x32xf32>, i32 -> vector<16x32xf32>
    %c-1_i32 = arith.constant -1 : i32
    %148 = vector.broadcast %c-1_i32 : i32 to vector<16x1xi32>
    %149 = arith.cmpi sge, %101, %148 : vector<16x1xi32>
    %c7_i32 = arith.constant 7 : i32
    %150 = vector.broadcast %c7_i32 : i32 to vector<16x1xi32>
    %151 = arith.cmpi slt, %101, %150 : vector<16x1xi32>
    %152 = arith.andi %149, %151 : vector<16x1xi1>
    %cst_58 = arith.constant 0.000000e+00 : f32
    %153 = vector.shape_cast %152 : vector<16x1xi1> to vector<16x1xi1>
    %154 = vector.broadcast %153 : vector<16x1xi1> to vector<16x32xi1>
    %155 = vector.broadcast %cst_58 : f32 to vector<16x32xf32>
    %156 = arith.select %154, %147, %155 : vector<16x32xi1>, vector<16x32xf32>
    %c4 = arith.constant 4 : index
    %c0_59 = arith.constant 0 : index
    %157 = vector.load %arg14[%c4, %c0_59] : memref<7x32xf32, #tpu.memory_space<vmem>>, vector<1x32xf32>
    %158 = vector.broadcast %157 : vector<1x32xf32> to vector<16x32xf32>
    %159 = arith.mulf %156, %158 : vector<16x32xf32>
    %160 = arith.addf %146, %159 : vector<16x32xf32>
    %c14_i32 = arith.constant 14 : i32
    %161 = tpu.dynamic_rotate %84 by %c14_i32 dim 0 : vector<16x32xf32>, i32 -> vector<16x32xf32>
    %c-2_i32 = arith.constant -2 : i32
    %162 = vector.broadcast %c-2_i32 : i32 to vector<16x1xi32>
    %163 = arith.cmpi sge, %101, %162 : vector<16x1xi32>
    %c6_i32 = arith.constant 6 : i32
    %164 = vector.broadcast %c6_i32 : i32 to vector<16x1xi32>
    %165 = arith.cmpi slt, %101, %164 : vector<16x1xi32>
    %166 = arith.andi %163, %165 : vector<16x1xi1>
    %cst_60 = arith.constant 0.000000e+00 : f32
    %167 = vector.shape_cast %166 : vector<16x1xi1> to vector<16x1xi1>
    %168 = vector.broadcast %167 : vector<16x1xi1> to vector<16x32xi1>
    %169 = vector.broadcast %cst_60 : f32 to vector<16x32xf32>
    %170 = arith.select %168, %161, %169 : vector<16x32xi1>, vector<16x32xf32>
    %c5 = arith.constant 5 : index
    %c0_61 = arith.constant 0 : index
    %171 = vector.load %arg14[%c5, %c0_61] : memref<7x32xf32, #tpu.memory_space<vmem>>, vector<1x32xf32>
    %172 = vector.broadcast %171 : vector<1x32xf32> to vector<16x32xf32>
    %173 = arith.mulf %170, %172 : vector<16x32xf32>
    %174 = arith.addf %160, %173 : vector<16x32xf32>
    %c13_i32 = arith.constant 13 : i32
    %175 = tpu.dynamic_rotate %84 by %c13_i32 dim 0 : vector<16x32xf32>, i32 -> vector<16x32xf32>
    %c-3_i32 = arith.constant -3 : i32
    %176 = vector.broadcast %c-3_i32 : i32 to vector<16x1xi32>
    %177 = arith.cmpi sge, %101, %176 : vector<16x1xi32>
    %c5_i32 = arith.constant 5 : i32
    %178 = vector.broadcast %c5_i32 : i32 to vector<16x1xi32>
    %179 = arith.cmpi slt, %101, %178 : vector<16x1xi32>
    %180 = arith.andi %177, %179 : vector<16x1xi1>
    %cst_62 = arith.constant 0.000000e+00 : f32
    %181 = vector.shape_cast %180 : vector<16x1xi1> to vector<16x1xi1>
    %182 = vector.broadcast %181 : vector<16x1xi1> to vector<16x32xi1>
    %183 = vector.broadcast %cst_62 : f32 to vector<16x32xf32>
    %184 = arith.select %182, %175, %183 : vector<16x32xi1>, vector<16x32xf32>
    %c6 = arith.constant 6 : index
    %c0_63 = arith.constant 0 : index
    %185 = vector.load %arg14[%c6, %c0_63] : memref<7x32xf32, #tpu.memory_space<vmem>>, vector<1x32xf32>
    %186 = vector.broadcast %185 : vector<1x32xf32> to vector<16x32xf32>
    %187 = arith.mulf %184, %186 : vector<16x32xf32>
    %188 = arith.addf %174, %187 : vector<16x32xf32>
    %c0_64 = arith.constant 0 : index
    %c0_65 = arith.constant 0 : index
    %189 = vector.load %arg15[%c0_64, %c0_65] : memref<1x32xf32, #tpu.memory_space<vmem>>, vector<1x32xf32>
    %190 = vector.broadcast %189 : vector<1x32xf32> to vector<16x32xf32>
    %191 = arith.addf %188, %190 : vector<16x32xf32>
    %c0_66 = arith.constant 0 : index
    %c0_67 = arith.constant 0 : index
    %192 = vector.load %arg18[%c0_66, %c0_67] : memref<1x32xf32, #tpu.memory_space<vmem>>, vector<1x32xf32>
    %193 = vector.broadcast %192 : vector<1x32xf32> to vector<16x32xf32>
    %194 = arith.subf %191, %193 : vector<16x32xf32>
    %c0_68 = arith.constant 0 : index
    %c0_69 = arith.constant 0 : index
    %195 = vector.load %arg19[%c0_68, %c0_69] : memref<1x32xf32, #tpu.memory_space<vmem>>, vector<1x32xf32>
    %cst_70 = arith.constant 9.99999974E-6 : f32
    %196 = vector.broadcast %cst_70 : f32 to vector<1x32xf32>
    %197 = arith.addf %195, %196 : vector<1x32xf32>
    %198 = math.rsqrt %197 : vector<1x32xf32>
    %199 = vector.broadcast %198 : vector<1x32xf32> to vector<16x32xf32>
    %200 = arith.mulf %194, %199 : vector<16x32xf32>
    %c0_71 = arith.constant 0 : index
    %c0_72 = arith.constant 0 : index
    %201 = vector.load %arg16[%c0_71, %c0_72] : memref<1x32xf32, #tpu.memory_space<vmem>>, vector<1x32xf32>
    %202 = vector.broadcast %201 : vector<1x32xf32> to vector<16x32xf32>
    %203 = arith.mulf %200, %202 : vector<16x32xf32>
    %c0_73 = arith.constant 0 : index
    %c0_74 = arith.constant 0 : index
    %204 = vector.load %arg17[%c0_73, %c0_74] : memref<1x32xf32, #tpu.memory_space<vmem>>, vector<1x32xf32>
    %205 = vector.broadcast %204 : vector<1x32xf32> to vector<16x32xf32>
    %206 = arith.addf %203, %205 : vector<16x32xf32>
    %207 = arith.negf %206 : vector<16x32xf32>
    %208 = math.exp %207 : vector<16x32xf32>
    %cst_75 = arith.constant 1.000000e+00 : f32
    %209 = vector.broadcast %cst_75 : f32 to vector<16x32xf32>
    %210 = arith.addf %209, %208 : vector<16x32xf32>
    %211 = arith.divf %209, %210 : vector<16x32xf32>
    %212 = arith.mulf %206, %211 : vector<16x32xf32>
    %c0_76 = arith.constant 0 : index
    %c0_77 = arith.constant 0 : index
    %213 = vector.load %arg20[%c0_76, %c0_77] : memref<32x32xf32, #tpu.memory_space<vmem>>, vector<32x32xf32>
    %cst_78 = arith.constant dense<0.000000e+00> : vector<16x32xf32>
    %214 = tpu.matmul %212, %213, %cst_78 {dimension_numbers = #tpu.dot_dimension_numbers<[1], [0], [0], [1], [0, 0, 1, 1], [], []>} : vector<16x32xf32>, vector<32x32xf32>, vector<16x32xf32> -> vector<16x32xf32>
    %c0_79 = arith.constant 0 : index
    %c0_80 = arith.constant 0 : index
    %215 = vector.load %arg21[%c0_79, %c0_80] : memref<1x32xf32, #tpu.memory_space<vmem>>, vector<1x32xf32>
    %216 = vector.broadcast %215 : vector<1x32xf32> to vector<16x32xf32>
    %217 = arith.addf %214, %216 : vector<16x32xf32>
    %218 = arith.addf %217, %44 : vector<16x32xf32>
    %c0_81 = arith.constant 0 : index
    %c0_82 = arith.constant 0 : index
    %219 = vector.load %arg22[%c0_81, %c0_82] : memref<1x32xf32, #tpu.memory_space<vmem>>, vector<1x32xf32>
    %c0_83 = arith.constant 0 : index
    %c0_84 = arith.constant 0 : index
    %220 = vector.load %arg23[%c0_83, %c0_84] : memref<1x32xf32, #tpu.memory_space<vmem>>, vector<1x32xf32>
    %cst_85 = arith.constant dense<0.000000e+00> : vector<16xf32>
    %221 = vector.multi_reduction <add>, %218, %cst_85 [1] : vector<16x32xf32> to vector<16xf32>
    %222 = vector.shape_cast %221 : vector<16xf32> to vector<16x1xf32>
    %cst_86 = arith.constant 3.200000e+01 : f32
    %223 = vector.broadcast %cst_86 : f32 to vector<16x1xf32>
    %224 = arith.divf %222, %223 : vector<16x1xf32>
    %225 = vector.broadcast %224 : vector<16x1xf32> to vector<16x32xf32>
    %226 = arith.subf %218, %225 : vector<16x32xf32>
    %227 = arith.mulf %226, %226 : vector<16x32xf32>
    %cst_87 = arith.constant dense<0.000000e+00> : vector<16xf32>
    %228 = vector.multi_reduction <add>, %227, %cst_87 [1] : vector<16x32xf32> to vector<16xf32>
    %229 = vector.shape_cast %228 : vector<16xf32> to vector<16x1xf32>
    %cst_88 = arith.constant 3.200000e+01 : f32
    %230 = vector.broadcast %cst_88 : f32 to vector<16x1xf32>
    %231 = arith.divf %229, %230 : vector<16x1xf32>
    %232 = vector.broadcast %224 : vector<16x1xf32> to vector<16x32xf32>
    %233 = arith.subf %218, %232 : vector<16x32xf32>
    %cst_89 = arith.constant 9.99999974E-6 : f32
    %234 = vector.broadcast %cst_89 : f32 to vector<16x1xf32>
    %235 = arith.addf %231, %234 : vector<16x1xf32>
    %236 = math.rsqrt %235 : vector<16x1xf32>
    %237 = vector.broadcast %236 : vector<16x1xf32> to vector<16x32xf32>
    %238 = arith.mulf %233, %237 : vector<16x32xf32>
    %239 = vector.broadcast %219 : vector<1x32xf32> to vector<16x32xf32>
    %240 = arith.mulf %238, %239 : vector<16x32xf32>
    %241 = vector.broadcast %220 : vector<1x32xf32> to vector<16x32xf32>
    %242 = arith.addf %240, %241 : vector<16x32xf32>
    %c0_90 = arith.constant 0 : index
    %c0_91 = arith.constant 0 : index
    %243 = vector.load %arg24[%c0_90, %c0_91] : memref<32x96xf32, #tpu.memory_space<vmem>>, vector<32x96xf32>
    %cst_92 = arith.constant dense<0.000000e+00> : vector<16x96xf32>
    %244 = tpu.matmul %242, %243, %cst_92 {dimension_numbers = #tpu.dot_dimension_numbers<[1], [0], [0], [1], [0, 0, 1, 1], [], []>} : vector<16x32xf32>, vector<32x96xf32>, vector<16x96xf32> -> vector<16x96xf32>
    %c0_93 = arith.constant 0 : index
    %c0_94 = arith.constant 0 : index
    %245 = vector.load %arg25[%c0_93, %c0_94] : memref<1x96xf32, #tpu.memory_space<vmem>>, vector<1x96xf32>
    %246 = vector.broadcast %245 : vector<1x96xf32> to vector<16x96xf32>
    %247 = arith.addf %244, %246 : vector<16x96xf32>
    %248 = vector.extract_strided_slice %247 {offsets = [0, 0], sizes = [16, 8], strides = [1, 1]} : vector<16x96xf32> to vector<16x8xf32>
    %249 = vector.extract_strided_slice %247 {offsets = [0, 32], sizes = [16, 8], strides = [1, 1]} : vector<16x96xf32> to vector<16x8xf32>
    %250 = vector.extract_strided_slice %247 {offsets = [0, 64], sizes = [16, 8], strides = [1, 1]} : vector<16x96xf32> to vector<16x8xf32>
    %cst_95 = arith.constant dense<0.000000e+00> : vector<16x16xf32>
    %251 = tpu.matmul %248, %249, %cst_95 {dimension_numbers = #tpu.dot_dimension_numbers<[1], [1], [0], [0], [0, 0, 1, 0], [], []>} : vector<16x8xf32>, vector<16x8xf32>, vector<16x16xf32> -> vector<16x16xf32>
    %cst_96 = arith.constant 0.353553385 : f32
    %252 = vector.broadcast %cst_96 : f32 to vector<16x16xf32>
    %253 = arith.mulf %251, %252 : vector<16x16xf32>
    %254 = arith.addf %253, %1 : vector<16x16xf32>
    %cst_97 = arith.constant dense<0xFF800000> : vector<16xf32>
    %255 = vector.multi_reduction <maximumf>, %254, %cst_97 [1] : vector<16x16xf32> to vector<16xf32>
    %256 = vector.shape_cast %255 : vector<16xf32> to vector<16x1xf32>
    %257 = vector.broadcast %256 : vector<16x1xf32> to vector<16x16xf32>
    %258 = arith.subf %254, %257 : vector<16x16xf32>
    %259 = math.exp %258 : vector<16x16xf32>
    %cst_98 = arith.constant dense<0.000000e+00> : vector<16xf32>
    %260 = vector.multi_reduction <add>, %259, %cst_98 [1] : vector<16x16xf32> to vector<16xf32>
    %261 = vector.shape_cast %260 : vector<16xf32> to vector<16x1xf32>
    %262 = tpu.reciprocal %261 {approx = true} : vector<16x1xf32> -> vector<16x1xf32>
    %263 = vector.broadcast %262 : vector<16x1xf32> to vector<16x16xf32>
    %264 = arith.mulf %259, %263 : vector<16x16xf32>
    %cst_99 = arith.constant dense<0.000000e+00> : vector<16x8xf32>
    %265 = tpu.matmul %264, %250, %cst_99 {dimension_numbers = #tpu.dot_dimension_numbers<[1], [0], [0], [1], [0, 0, 1, 1], [], []>} : vector<16x16xf32>, vector<16x8xf32>, vector<16x8xf32> -> vector<16x8xf32>
    %266 = vector.extract_strided_slice %247 {offsets = [0, 8], sizes = [16, 8], strides = [1, 1]} : vector<16x96xf32> to vector<16x8xf32>
    %267 = vector.extract_strided_slice %247 {offsets = [0, 40], sizes = [16, 8], strides = [1, 1]} : vector<16x96xf32> to vector<16x8xf32>
    %268 = vector.extract_strided_slice %247 {offsets = [0, 72], sizes = [16, 8], strides = [1, 1]} : vector<16x96xf32> to vector<16x8xf32>
    %cst_100 = arith.constant dense<0.000000e+00> : vector<16x16xf32>
    %269 = tpu.matmul %266, %267, %cst_100 {dimension_numbers = #tpu.dot_dimension_numbers<[1], [1], [0], [0], [0, 0, 1, 0], [], []>} : vector<16x8xf32>, vector<16x8xf32>, vector<16x16xf32> -> vector<16x16xf32>
    %cst_101 = arith.constant 0.353553385 : f32
    %270 = vector.broadcast %cst_101 : f32 to vector<16x16xf32>
    %271 = arith.mulf %269, %270 : vector<16x16xf32>
    %272 = arith.addf %271, %1 : vector<16x16xf32>
    %cst_102 = arith.constant dense<0xFF800000> : vector<16xf32>
    %273 = vector.multi_reduction <maximumf>, %272, %cst_102 [1] : vector<16x16xf32> to vector<16xf32>
    %274 = vector.shape_cast %273 : vector<16xf32> to vector<16x1xf32>
    %275 = vector.broadcast %274 : vector<16x1xf32> to vector<16x16xf32>
    %276 = arith.subf %272, %275 : vector<16x16xf32>
    %277 = math.exp %276 : vector<16x16xf32>
    %cst_103 = arith.constant dense<0.000000e+00> : vector<16xf32>
    %278 = vector.multi_reduction <add>, %277, %cst_103 [1] : vector<16x16xf32> to vector<16xf32>
    %279 = vector.shape_cast %278 : vector<16xf32> to vector<16x1xf32>
    %280 = tpu.reciprocal %279 {approx = true} : vector<16x1xf32> -> vector<16x1xf32>
    %281 = vector.broadcast %280 : vector<16x1xf32> to vector<16x16xf32>
    %282 = arith.mulf %277, %281 : vector<16x16xf32>
    %cst_104 = arith.constant dense<0.000000e+00> : vector<16x8xf32>
    %283 = tpu.matmul %282, %268, %cst_104 {dimension_numbers = #tpu.dot_dimension_numbers<[1], [0], [0], [1], [0, 0, 1, 1], [], []>} : vector<16x16xf32>, vector<16x8xf32>, vector<16x8xf32> -> vector<16x8xf32>
    %284 = vector.extract_strided_slice %247 {offsets = [0, 16], sizes = [16, 8], strides = [1, 1]} : vector<16x96xf32> to vector<16x8xf32>
    %285 = vector.extract_strided_slice %247 {offsets = [0, 48], sizes = [16, 8], strides = [1, 1]} : vector<16x96xf32> to vector<16x8xf32>
    %286 = vector.extract_strided_slice %247 {offsets = [0, 80], sizes = [16, 8], strides = [1, 1]} : vector<16x96xf32> to vector<16x8xf32>
    %cst_105 = arith.constant dense<0.000000e+00> : vector<16x16xf32>
    %287 = tpu.matmul %284, %285, %cst_105 {dimension_numbers = #tpu.dot_dimension_numbers<[1], [1], [0], [0], [0, 0, 1, 0], [], []>} : vector<16x8xf32>, vector<16x8xf32>, vector<16x16xf32> -> vector<16x16xf32>
    %cst_106 = arith.constant 0.353553385 : f32
    %288 = vector.broadcast %cst_106 : f32 to vector<16x16xf32>
    %289 = arith.mulf %287, %288 : vector<16x16xf32>
    %290 = arith.addf %289, %1 : vector<16x16xf32>
    %cst_107 = arith.constant dense<0xFF800000> : vector<16xf32>
    %291 = vector.multi_reduction <maximumf>, %290, %cst_107 [1] : vector<16x16xf32> to vector<16xf32>
    %292 = vector.shape_cast %291 : vector<16xf32> to vector<16x1xf32>
    %293 = vector.broadcast %292 : vector<16x1xf32> to vector<16x16xf32>
    %294 = arith.subf %290, %293 : vector<16x16xf32>
    %295 = math.exp %294 : vector<16x16xf32>
    %cst_108 = arith.constant dense<0.000000e+00> : vector<16xf32>
    %296 = vector.multi_reduction <add>, %295, %cst_108 [1] : vector<16x16xf32> to vector<16xf32>
    %297 = vector.shape_cast %296 : vector<16xf32> to vector<16x1xf32>
    %298 = tpu.reciprocal %297 {approx = true} : vector<16x1xf32> -> vector<16x1xf32>
    %299 = vector.broadcast %298 : vector<16x1xf32> to vector<16x16xf32>
    %300 = arith.mulf %295, %299 : vector<16x16xf32>
    %cst_109 = arith.constant dense<0.000000e+00> : vector<16x8xf32>
    %301 = tpu.matmul %300, %286, %cst_109 {dimension_numbers = #tpu.dot_dimension_numbers<[1], [0], [0], [1], [0, 0, 1, 1], [], []>} : vector<16x16xf32>, vector<16x8xf32>, vector<16x8xf32> -> vector<16x8xf32>
    %302 = vector.extract_strided_slice %247 {offsets = [0, 24], sizes = [16, 8], strides = [1, 1]} : vector<16x96xf32> to vector<16x8xf32>
    %303 = vector.extract_strided_slice %247 {offsets = [0, 56], sizes = [16, 8], strides = [1, 1]} : vector<16x96xf32> to vector<16x8xf32>
    %304 = vector.extract_strided_slice %247 {offsets = [0, 88], sizes = [16, 8], strides = [1, 1]} : vector<16x96xf32> to vector<16x8xf32>
    %cst_110 = arith.constant dense<0.000000e+00> : vector<16x16xf32>
    %305 = tpu.matmul %302, %303, %cst_110 {dimension_numbers = #tpu.dot_dimension_numbers<[1], [1], [0], [0], [0, 0, 1, 0], [], []>} : vector<16x8xf32>, vector<16x8xf32>, vector<16x16xf32> -> vector<16x16xf32>
    %cst_111 = arith.constant 0.353553385 : f32
    %306 = vector.broadcast %cst_111 : f32 to vector<16x16xf32>
    %307 = arith.mulf %305, %306 : vector<16x16xf32>
    %308 = arith.addf %307, %1 : vector<16x16xf32>
    %cst_112 = arith.constant dense<0xFF800000> : vector<16xf32>
    %309 = vector.multi_reduction <maximumf>, %308, %cst_112 [1] : vector<16x16xf32> to vector<16xf32>
    %310 = vector.shape_cast %309 : vector<16xf32> to vector<16x1xf32>
    %311 = vector.broadcast %310 : vector<16x1xf32> to vector<16x16xf32>
    %312 = arith.subf %308, %311 : vector<16x16xf32>
    %313 = math.exp %312 : vector<16x16xf32>
    %cst_113 = arith.constant dense<0.000000e+00> : vector<16xf32>
    %314 = vector.multi_reduction <add>, %313, %cst_113 [1] : vector<16x16xf32> to vector<16xf32>
    %315 = vector.shape_cast %314 : vector<16xf32> to vector<16x1xf32>
    %316 = tpu.reciprocal %315 {approx = true} : vector<16x1xf32> -> vector<16x1xf32>
    %317 = vector.broadcast %316 : vector<16x1xf32> to vector<16x16xf32>
    %318 = arith.mulf %313, %317 : vector<16x16xf32>
    %cst_114 = arith.constant dense<0.000000e+00> : vector<16x8xf32>
    %319 = tpu.matmul %318, %304, %cst_114 {dimension_numbers = #tpu.dot_dimension_numbers<[1], [0], [0], [1], [0, 0, 1, 1], [], []>} : vector<16x16xf32>, vector<16x8xf32>, vector<16x8xf32> -> vector<16x8xf32>
    %320 = tpu.concatenate %265, %283, %301, %319 in 1 : vector<16x8xf32>, vector<16x8xf32>, vector<16x8xf32>, vector<16x8xf32> -> vector<16x32xf32>
    %c0_115 = arith.constant 0 : index
    %c0_116 = arith.constant 0 : index
    %321 = vector.load %arg26[%c0_115, %c0_116] : memref<32x32xf32, #tpu.memory_space<vmem>>, vector<32x32xf32>
    %cst_117 = arith.constant dense<0.000000e+00> : vector<16x32xf32>
    %322 = tpu.matmul %320, %321, %cst_117 {dimension_numbers = #tpu.dot_dimension_numbers<[1], [0], [0], [1], [0, 0, 1, 1], [], []>} : vector<16x32xf32>, vector<32x32xf32>, vector<16x32xf32> -> vector<16x32xf32>
    %c0_118 = arith.constant 0 : index
    %c0_119 = arith.constant 0 : index
    %323 = vector.load %arg27[%c0_118, %c0_119] : memref<1x32xf32, #tpu.memory_space<vmem>>, vector<1x32xf32>
    %324 = vector.broadcast %323 : vector<1x32xf32> to vector<16x32xf32>
    %325 = arith.addf %322, %324 : vector<16x32xf32>
    %326 = arith.addf %325, %218 : vector<16x32xf32>
    %c0_120 = arith.constant 0 : index
    %c0_121 = arith.constant 0 : index
    %327 = vector.load %arg28[%c0_120, %c0_121] : memref<1x32xf32, #tpu.memory_space<vmem>>, vector<1x32xf32>
    %c0_122 = arith.constant 0 : index
    %c0_123 = arith.constant 0 : index
    %328 = vector.load %arg29[%c0_122, %c0_123] : memref<1x32xf32, #tpu.memory_space<vmem>>, vector<1x32xf32>
    %cst_124 = arith.constant dense<0.000000e+00> : vector<16xf32>
    %329 = vector.multi_reduction <add>, %326, %cst_124 [1] : vector<16x32xf32> to vector<16xf32>
    %330 = vector.shape_cast %329 : vector<16xf32> to vector<16x1xf32>
    %cst_125 = arith.constant 3.200000e+01 : f32
    %331 = vector.broadcast %cst_125 : f32 to vector<16x1xf32>
    %332 = arith.divf %330, %331 : vector<16x1xf32>
    %333 = vector.broadcast %332 : vector<16x1xf32> to vector<16x32xf32>
    %334 = arith.subf %326, %333 : vector<16x32xf32>
    %335 = arith.mulf %334, %334 : vector<16x32xf32>
    %cst_126 = arith.constant dense<0.000000e+00> : vector<16xf32>
    %336 = vector.multi_reduction <add>, %335, %cst_126 [1] : vector<16x32xf32> to vector<16xf32>
    %337 = vector.shape_cast %336 : vector<16xf32> to vector<16x1xf32>
    %cst_127 = arith.constant 3.200000e+01 : f32
    %338 = vector.broadcast %cst_127 : f32 to vector<16x1xf32>
    %339 = arith.divf %337, %338 : vector<16x1xf32>
    %340 = vector.broadcast %332 : vector<16x1xf32> to vector<16x32xf32>
    %341 = arith.subf %326, %340 : vector<16x32xf32>
    %cst_128 = arith.constant 9.99999974E-6 : f32
    %342 = vector.broadcast %cst_128 : f32 to vector<16x1xf32>
    %343 = arith.addf %339, %342 : vector<16x1xf32>
    %344 = math.rsqrt %343 : vector<16x1xf32>
    %345 = vector.broadcast %344 : vector<16x1xf32> to vector<16x32xf32>
    %346 = arith.mulf %341, %345 : vector<16x32xf32>
    %347 = vector.broadcast %327 : vector<1x32xf32> to vector<16x32xf32>
    %348 = arith.mulf %346, %347 : vector<16x32xf32>
    %349 = vector.broadcast %328 : vector<1x32xf32> to vector<16x32xf32>
    %350 = arith.addf %348, %349 : vector<16x32xf32>
    %c0_129 = arith.constant 0 : index
    %c0_130 = arith.constant 0 : index
    %351 = vector.load %arg30[%c0_129, %c0_130] : memref<32x128xf32, #tpu.memory_space<vmem>>, vector<32x128xf32>
    %cst_131 = arith.constant dense<0.000000e+00> : vector<16x128xf32>
    %352 = tpu.matmul %350, %351, %cst_131 {dimension_numbers = #tpu.dot_dimension_numbers<[1], [0], [0], [1], [0, 0, 1, 1], [], []>} : vector<16x32xf32>, vector<32x128xf32>, vector<16x128xf32> -> vector<16x128xf32>
    %c0_132 = arith.constant 0 : index
    %c0_133 = arith.constant 0 : index
    %353 = vector.load %arg31[%c0_132, %c0_133] : memref<1x128xf32, #tpu.memory_space<vmem>>, vector<1x128xf32>
    %354 = vector.broadcast %353 : vector<1x128xf32> to vector<16x128xf32>
    %355 = arith.addf %352, %354 : vector<16x128xf32>
    %356 = arith.negf %355 : vector<16x128xf32>
    %357 = math.exp %356 : vector<16x128xf32>
    %cst_134 = arith.constant 1.000000e+00 : f32
    %358 = vector.broadcast %cst_134 : f32 to vector<16x128xf32>
    %359 = arith.addf %358, %357 : vector<16x128xf32>
    %360 = arith.divf %358, %359 : vector<16x128xf32>
    %361 = arith.mulf %355, %360 : vector<16x128xf32>
    %c0_135 = arith.constant 0 : index
    %c0_136 = arith.constant 0 : index
    %362 = vector.load %arg32[%c0_135, %c0_136] : memref<128x32xf32, #tpu.memory_space<vmem>>, vector<128x32xf32>
    %cst_137 = arith.constant dense<0.000000e+00> : vector<16x32xf32>
    %363 = tpu.matmul %361, %362, %cst_137 {dimension_numbers = #tpu.dot_dimension_numbers<[1], [0], [0], [1], [0, 0, 1, 1], [], []>} : vector<16x128xf32>, vector<128x32xf32>, vector<16x32xf32> -> vector<16x32xf32>
    %c0_138 = arith.constant 0 : index
    %c0_139 = arith.constant 0 : index
    %364 = vector.load %arg33[%c0_138, %c0_139] : memref<1x32xf32, #tpu.memory_space<vmem>>, vector<1x32xf32>
    %365 = vector.broadcast %364 : vector<1x32xf32> to vector<16x32xf32>
    %366 = arith.addf %363, %365 : vector<16x32xf32>
    %cst_140 = arith.constant 5.000000e-01 : f32
    %367 = vector.broadcast %cst_140 : f32 to vector<16x32xf32>
    %368 = arith.mulf %367, %366 : vector<16x32xf32>
    %369 = arith.addf %368, %326 : vector<16x32xf32>
    %c0_141 = arith.constant 0 : index
    %c0_142 = arith.constant 0 : index
    %370 = vector.load %arg34[%c0_141, %c0_142] : memref<1x32xf32, #tpu.memory_space<vmem>>, vector<1x32xf32>
    %c0_143 = arith.constant 0 : index
    %c0_144 = arith.constant 0 : index
    %371 = vector.load %arg35[%c0_143, %c0_144] : memref<1x32xf32, #tpu.memory_space<vmem>>, vector<1x32xf32>
    %cst_145 = arith.constant dense<0.000000e+00> : vector<16xf32>
    %372 = vector.multi_reduction <add>, %369, %cst_145 [1] : vector<16x32xf32> to vector<16xf32>
    %373 = vector.shape_cast %372 : vector<16xf32> to vector<16x1xf32>
    %cst_146 = arith.constant 3.200000e+01 : f32
    %374 = vector.broadcast %cst_146 : f32 to vector<16x1xf32>
    %375 = arith.divf %373, %374 : vector<16x1xf32>
    %376 = vector.broadcast %375 : vector<16x1xf32> to vector<16x32xf32>
    %377 = arith.subf %369, %376 : vector<16x32xf32>
    %378 = arith.mulf %377, %377 : vector<16x32xf32>
    %cst_147 = arith.constant dense<0.000000e+00> : vector<16xf32>
    %379 = vector.multi_reduction <add>, %378, %cst_147 [1] : vector<16x32xf32> to vector<16xf32>
    %380 = vector.shape_cast %379 : vector<16xf32> to vector<16x1xf32>
    %cst_148 = arith.constant 3.200000e+01 : f32
    %381 = vector.broadcast %cst_148 : f32 to vector<16x1xf32>
    %382 = arith.divf %380, %381 : vector<16x1xf32>
    %383 = vector.broadcast %375 : vector<16x1xf32> to vector<16x32xf32>
    %384 = arith.subf %369, %383 : vector<16x32xf32>
    %cst_149 = arith.constant 9.99999974E-6 : f32
    %385 = vector.broadcast %cst_149 : f32 to vector<16x1xf32>
    %386 = arith.addf %382, %385 : vector<16x1xf32>
    %387 = math.rsqrt %386 : vector<16x1xf32>
    %388 = vector.broadcast %387 : vector<16x1xf32> to vector<16x32xf32>
    %389 = arith.mulf %384, %388 : vector<16x32xf32>
    %390 = vector.broadcast %370 : vector<1x32xf32> to vector<16x32xf32>
    %391 = arith.mulf %389, %390 : vector<16x32xf32>
    %392 = vector.broadcast %371 : vector<1x32xf32> to vector<16x32xf32>
    %393 = arith.addf %391, %392 : vector<16x32xf32>
    %c0_150 = arith.constant 0 : index
    %c0_151 = arith.constant 0 : index
    %394 = vector.load %arg36[%c0_150, %c0_151] : memref<16x32xf32, #tpu.memory_space<vmem>>, vector<16x32xf32>
    tpu.vector_store %arg36[%c0_150, %c0_151], %393 {strides = array<i32>} : memref<16x32xf32, #tpu.memory_space<vmem>>, vector<16x32xf32>,
    return
  }
}

</mosaic_0001>

<bundles_post_ra>
// kernel: tpu_custom_call.1
= control target key start
LH: loop header
LB: loop body
LE: loop exit
PB: predicated region body
PF: predicated region fallthrough
CT: control target
= control target key end

     0   :  { %s3168_s6 = smov 1   ;;  %s3169_s10 = smov 2   ;;  %s3783_s0 = inlined_call_operand.smem [shape: u32[37], index: -1, kind: input, shape index: {}] }
   0x1   :  { %s3228_s5 = sld [smem:[%s3783_s0]]   ;;  %s3170_s14 = smov 3  }
   0x2   :  { %s3233_s9 = sld [smem:[%s3783_s0 + %s3168_s6]]   ;;  %s3171_s18 = smov 4  }
   0x3   :  { %s3238_s13 = sld [smem:[%s3783_s0 + %s3169_s10]]   ;;  %s3172_s22 = smov 5  }
   0x4   :  { %s3243_s17 = sld [smem:[%s3783_s0 + %s3170_s14]]   ;;  %s3173_s26 = smov 6  }
   0x5   :  { %s3248_s21 = sld [smem:[%s3783_s0 + %s3171_s18]]   ;;  %s3174_s30 = smov 7  }
   0x6   :  { %s3253_s25 = sld [smem:[%s3783_s0 + %s3172_s22]]   ;;  %s3175_s4 = smov 8  }
   0x7   :  { %s3258_s29 = sld [smem:[%s3783_s0 + %s3173_s26]]   ;;  %s3176_s10 = smov 9  }
   0x8   :  { %3791 = sst [smem:[#allocation5_spill]] %s3233_s9  ;;  %s3177_s15 = smov 10  }
   0x9   :  { %s3263_s3 = sld [smem:[%s3783_s0 + %s3174_s30]]   ;;  %s3178_s20 = smov 11  }
   0xa   :  { %s3268_s8 = sld [smem:[%s3783_s0 + %s3175_s4]]   ;;  %s3179_s26 = smov 12  }
   0xb   :  { %s3273_s14 = sld [smem:[%s3783_s0 + %s3176_s10]]   ;;  %s3180_s1 = smov 13  }
   0xc   :  { %s3278_s19 = sld [smem:[%s3783_s0 + %s3177_s15]]   ;;  %s3181_s7 = smov 14  }
   0xd   :  { %s3283_s24 = sld [smem:[%s3783_s0 + %s3178_s20]]   ;;  %s3182_s15 = smov 15  }
   0xe   :  { %s3288_s30 = sld [smem:[%s3783_s0 + %s3179_s26]]   ;;  %s3183_s22 = smov 16  }
   0xf   :  { %s3293_s6 = sld [smem:[%s3783_s0 + %s3180_s1]]   ;;  %s3184_s28 = smov 17  }
  0x10   :  { %s3298_s12 = sld [smem:[%s3783_s0 + %s3181_s7]]   ;;  %s3185_s7 = smov 18  }
  0x11   :  { %s3303_s20 = sld [smem:[%s3783_s0 + %s3182_s15]]   ;;  %s3186_s15 = smov 19  }
  0x12   :  { %s3308_s27 = sld [smem:[%s3783_s0 + %s3183_s22]]   ;;  %s3187_s22 = smov 20  }
  0x13   :  { %s3313_s4 = sld [smem:[%s3783_s0 + %s3184_s28]]   ;;  %s3188_s28 = smov 21  }
  0x14   :  { %s3318_s9 = sld [smem:[%s3783_s0 + %s3185_s7]]   ;;  %s3189_s7 = smov 22  }
  0x16   :  { %3792 = sst [smem:[#allocation6_spill]] %s3298_s12 }
  0x17   :  { %3793 = sst [smem:[#allocation7_spill]] %s3303_s20 }
  0x18   :  { %3794 = sst [smem:[#allocation8_spill]] %s3308_s27 }
  0x19   :  { %3795 = sst [smem:[#allocation9_spill]] %s3313_s4 }
  0x1a   :  { %3796 = sst [smem:[#allocation10_spill]] %s3318_s9 }
  0x1b   :  { %s3323_s20 = sld [smem:[%s3783_s0 + %s3186_s15]]   ;;  %s3190_s15 = smov 23  }
  0x1c   :  { %s3328_s27 = sld [smem:[%s3783_s0 + %s3187_s22]]   ;;  %s3191_s22 = smov 24  }
  0x1d   :  { %s3333_s4 = sld [smem:[%s3783_s0 + %s3188_s28]]   ;;  %s3192_s28 = smov 25  }
  0x1e   :  { %s3338_s9 = sld [smem:[%s3783_s0 + %s3189_s7]]   ;;  %s3193_s7 = smov 26  }
  0x1f   :  { %s3343_s12 = sld [smem:[%s3783_s0 + %s3190_s15]]   ;;  %s3194_s15 = smov 27  }
  0x21   :  { %3797 = sst [smem:[#allocation11_spill]] %s3323_s20 }
  0x22   :  { %s3348_s20 = sld [smem:[%s3783_s0 + %s3191_s22]]   ;;  %s3195_s22 = smov 28  }
  0x23   :  { %3798 = sst [smem:[#allocation12_spill]] %s3333_s4 }
  0x24   :  { %3799 = sst [smem:[#allocation13_spill]] %s3338_s9 }
  0x25   :  { %3800 = sst [smem:[#allocation14_spill]] %s3343_s12 }
  0x26   :  { %s3353_s4 = sld [smem:[%s3783_s0 + %s3192_s28]]   ;;  %s3196_s28 = smov 29  }
  0x27   :  { %s3358_s9 = sld [smem:[%s3783_s0 + %s3193_s7]]   ;;  %s3197_s7 = smov 30  }
  0x28   :  { %3801 = sst [smem:[#allocation15_spill]] %s3348_s20 }
  0x29   :  { %s3363_s12 = sld [smem:[%s3783_s0 + %s3194_s15]]   ;;  %s3198_s15 = smov 31  }
  0x2a   :  { %s3368_s20 = sld [smem:[%s3783_s0 + %s3195_s22]]   ;;  %s3199_s22 = smov 32  }
  0x2c   :  { %3802 = sst [smem:[#allocation16_spill]] %s3353_s4 }
  0x2d   :  { %3803 = sst [smem:[#allocation17_spill]] %s3358_s9 }
  0x2e   :  { %s3373_s4 = sld [smem:[%s3783_s0 + %s3196_s28]]   ;;  %s3200_s28 = smov 33  }
  0x2f   :  { %3804 = sst [smem:[#allocation18_spill]] %s3363_s12 }
  0x30   :  { %3805 = sst [smem:[#allocation19_spill]] %s3368_s20 }
  0x31   :  { %s3378_s9 = sld [smem:[%s3783_s0 + %s3197_s7]]   ;;  %s3201_s7 = smov 34  }
  0x32   :  { %s3383_s12 = sld [smem:[%s3783_s0 + %s3198_s15]]   ;;  %s3202_s15 = smov 35  }
  0x33   :  { %s3388_s20 = sld [smem:[%s3783_s0 + %s3199_s22]]   ;;  %s3203_s22 = smov 36  }
  0x34   :  { %3806 = sst [smem:[#allocation20_spill]] %s3373_s4 }
  0x35   :  { %s3393_s4 = sld [smem:[%s3783_s0 + %s3200_s28]]  }
  0x37   :  { %3807 = sst [smem:[#allocation21_spill]] %s3378_s9 }
  0x38   :  { %3808 = sst [smem:[#allocation22_spill]] %s3383_s12 }
  0x39   :  { %3809 = sst [smem:[#allocation23_spill]] %s3388_s20 }
  0x3a   :  { %s3398_s9 = sld [smem:[%s3783_s0 + %s3201_s7]]  }
  0x3b   :  { %s3403_s12 = sld [smem:[%s3783_s0 + %s3202_s15]]  }
  0x3c   :  { %s3408_s20 = sld [smem:[%s3783_s0 + %s3203_s22]]  }
  0x3d   :  { %v3411_v0 = vld [vmem:[%s3228_s5] sm:$0xff]  ;;  %vm3790_vm0 = vcmask 261120   ;;  %v3414_v1 = vld [vmem:[%s3228_s5 + $0x8] sm:$0xff] }
  0x3e   :  { %78 = vsyncpa [#allocation3], 0  ;;  %v158_v2 = vsel %vm3790_vm0, %v3411_v0, 0.0  ;;  %v161_v3 = vsel %vm3790_vm0, %v3414_v1, 0.0  ;;  %v201_v14 = vld [vmem:[%s3248_s21] sm:$0xff]  ;;  %v202_v15 = vld [vmem:[%s3248_s21 + $0x8] sm:$0xff] }
  0x3f   :  { %159 = vadd.xlane.f32.xlu0 %v158_v2  ;;  %v203_v16 = vld [vmem:[%s3248_s21 + $0x10] sm:$0xff]  ;;  %v2806_v17 = vpack.c.bf16 %v202_v15, %v201_v14  ;;  %v204_v18 = vld [vmem:[%s3248_s21 + $0x18] sm:$0xff]  ;;  %v2417_v27 = vld [vmem:[%s3238_s13] ss:$0 sm:$0xff]  ;;  %s3810_s0 = sld [smem:[#allocation11_spill]]  ;;  %s3811_s5 = sld [smem:[#allocation6_spill]] }
  0x40   :  { %v2810_v19 = vpack.c.bf16 %v204_v18, %v203_v16  ;;  %v2418_v29 = vld [vmem:[%s3243_s17] ss:$0 sm:$0xff]  ;;  %v308_v37 = vld [vmem:[%s3258_s29 + $0x8] sm:$0xff]  ;;  %v309_v39 = vld [vmem:[%s3258_s29 + $0x10] sm:$0xff]  ;;  %s3812_s13 = sld [smem:[#allocation7_spill]]  ;;  %s3813_s17 = sld [smem:[#allocation10_spill]] }
  0x41   :  { %2807 = vmatprep.subr.bf16.mxu1 %v2806_v17  ;;  %v307_v36 = vld [vmem:[%s3258_s29] sm:$0xff]  ;;  %v310_v40 = vld [vmem:[%s3258_s29 + $0x18] sm:$0xff]  ;;  %v312_v43 = vld [vmem:[%s3258_s29 + $0x28] sm:$0xff]  ;;  %s3814_s21 = sld [smem:[#allocation8_spill]]  ;;  %s3207_s28 = smov 56  }
  0x42   :  { %2809 = vmatpush3.bf16.msra.mxu1 %v2806_v17  ;;  %v2814_v38 = vpack.c.bf16 %v308_v37, %v307_v36  ;;  %v2818_v41 = vpack.c.bf16 %v310_v40, %v309_v39  ;;  %v311_v42 = vld [vmem:[%s3258_s29 + $0x20] sm:$0xff]  ;;  %v313_v45 = vld [vmem:[%s3258_s29 + $0x30] sm:$0xff]  ;;  %v314_v46 = vld [vmem:[%s3258_s29 + $0x38] sm:$0xff]  ;;  %s3208_s1 = smov 64   ;;  %s3209_s2 = smov 80  }
  0x43   :  { %162 = vadd.xlane.f32.xlu0 %v161_v3  ;;  %2811 = vmatprep.subr.bf16.mxu1 %v2810_v19  ;;  %v2822_v44 = vpack.c.bf16 %v312_v43, %v311_v42  ;;  %v2826_v47 = vpack.c.bf16 %v314_v46, %v313_v45  ;;  %v315_v48 = vld [vmem:[%s3258_s29 + $0x40] sm:$0xff]  ;;  %v316_v49 = vld [vmem:[%s3258_s29 + $0x48] sm:$0xff]  ;;  %v317_v51 = vld [vmem:[%s3258_s29 + $0x50] sm:$0xff]  ;;  %s3210_s7 = smov 112   ;;  %s3211_s10 = smov 48  }
  0x44   :  { %v2830_v50 = vpack.c.bf16 %v316_v49, %v315_v48  ;;  %v318_v52 = vld [vmem:[%s3258_s29 + $0x58] sm:$0xff]  ;;  %v319_v54 = vld [vmem:[%s3258_s29 + $0x60] sm:$0xff]  ;;  %v320_v55 = vld [vmem:[%s3258_s29 + $0x68] sm:$0xff]  ;;  %s3212_s11 = smov 104   ;;  %s3213_s15 = smov 72  }
  0x45   :  { %v2834_v53 = vpack.c.bf16 %v318_v52, %v317_v51  ;;  %v2838_v56 = vpack.c.bf16 %v320_v55, %v319_v54  ;;  %v321_v57 = vld [vmem:[%s3258_s29 + $0x70] sm:$0xff]  ;;  %v322_v58 = vld [vmem:[%s3258_s29 + $0x78] sm:$0xff]  ;;  %v2419_v60 = vld [vmem:[%s3253_s25] ss:$0 sm:$0xff]  ;;  %s3815_s25 = sld [smem:[#allocation9_spill]]  ;;  %s3816_s29 = sld [smem:[#allocation12_spill]] }
  0x46   :  { %2813 = vmatpush3.bf16.msra.mxu1 %v2810_v19  ;;  %v2842_v59 = vpack.c.bf16 %v322_v58, %v321_v57  ;;  %v546_v36 = vld [vmem:[%s3288_s30 + $0x8] sm:$0xff]  ;;  %v456_v39 = vld [vmem:[%s3278_s19 + $0x18] sm:$0xff]  ;;  %v547_v40 = vld [vmem:[%s3288_s30 + $0x10] sm:$0xff]  ;;  %s3214_s16 = smov 40   ;;  %s3215_s18 = smov 8  }
  0x47   :  { %2815 = vmatprep.subr.bf16.mxu1 %v2814_v38  ;;  %v548_v42 = vld [vmem:[%s3288_s30 + $0x18] sm:$0xff]  ;;  %v2425_v51 = vld [vmem:[%s3268_s8] ss:$0 sm:$0xff]  ;;  %s3824_s8 = sld [smem:[#allocation13_spill]]  ;;  %s3216_s22 = smov 16  }
  0x48   :  { %v2858_v43 = vpack.c.bf16 %v548_v42, %v547_v40  ;;  %v2426_v55 = vld [vmem:[%s3273_s14] ss:$0 sm:$0xff]  ;;  %s3825_s14 = sld [smem:[#allocation14_spill]]  ;;  %s3832_s23 = sld [smem:[#allocation17_spill]] }
  0x49   :  { %s3217_s26 = smov 24  }
  0xcc   :  { %v160_v4 = vpop.xlane.xlu0 %159 }
  0xcd   :  { %v165_v5 = vmul.f32 0.03125, %v160_v4 }
  0xcf   :  { %v167_v6 = vsub.f32 %v3411_v0, %v165_v5 }
  0xd0   :  { %v163_v7 = vpop.xlane.xlu0 %162 }
  0xd1   :  { %v166_v8 = vmul.f32 0.03125, %v163_v7  ;;  %v169_v9 = vmul.f32 %v167_v6, %v167_v6 }
  0xd3   :  { %v168_v10 = vsub.f32 %v3414_v1, %v166_v8  ;;  %v171_v11 = vsel %vm3790_vm0, %v169_v9, 0.0 }
  0xd4   :  { %172 = vadd.xlane.f32.xlu1 %v171_v11 }
  0xd5   :  { %v170_v12 = vmul.f32 %v168_v10, %v168_v10 }
  0xd7   :  { %v174_v13 = vsel %vm3790_vm0, %v170_v12, 0.0 }
  0xd8   :  { %175 = vadd.xlane.f32.xlu1 %v174_v13  ;;  %v2424_v13 = vld [vmem:[%s3263_s3] ss:$0 sm:$0xff]  ;;  %s3820_s3 = sld [smem:[#allocation15_spill]] }
 0x161   :  { %v173_v20 = vpop.xlane.xlu1 %172 }
 0x162   :  { %v177_v21 = vmul.f32 0.03125, %v173_v20 }
 0x164   :  { %v179_v22 = vadd.f32 1e-05, %v177_v21 }
 0x165   :  { %v176_v23 = vpop.xlane.xlu1 %175 }
 0x166   :  { %3058 = vrsqrt.f32 %v179_v22  ;;  %v178_v24 = vmul.f32 0.03125, %v176_v23 }
 0x168   :  { %v180_v25 = vadd.f32 1e-05, %v178_v24 }
 0x16a   :  { %3060 = vrsqrt.f32 %v180_v25 }
 0x170   :  { %v3059_v26 = vpop.eup %3058 }
 0x171   :  { %v183_v28 = vmul.f32 %v3059_v26, %v167_v6 }
 0x173   :  { %v191_v30 = vmul.f32 %v2417_v27, %v183_v28 }
 0x174   :  { %v3061_v31 = vpop.eup %3060 }
 0x175   :  { %v184_v32 = vmul.f32 %v3061_v31, %v168_v10  ;;  %v199_v33 = vadd.f32 %v2418_v29, %v191_v30 }
 0x177   :  { %v192_v34 = vmul.f32 %v2417_v27, %v184_v32  ;;  %2611 = vmatprep.mubr.msk.f32.mxu1 %vm3790_vm0, %v199_v33  ;;  %v453_v32 = vld [vmem:[%s3278_s19] sm:$0xff]  ;;  %v454_v33 = vld [vmem:[%s3278_s19 + $0x8] sm:$0xff] }
 0x179   :  { %v200_v35 = vadd.f32 %v2418_v29, %v192_v34  ;;  %v545_v34 = vld [vmem:[%s3288_s30] sm:$0xff]  ;;  %s3205_s30 = smov 96  }
 0x17a   :  { %v2854_v37 = vpack.c.bf16 %v546_v36, %v545_v34  ;;  %v2435_v34 = vld [vmem:[%s3811_s5] ss:$0 sm:$0xff] }
 0x17b   :  { %2612 = vmatmul.mubr.msk.f32.vlgmr.msra.gmra.mrb[0].mxu1 %vm3790_vm0, %v200_v35  ;;  %v2846_v35 = vpack.c.bf16 %v454_v33, %v453_v32 }
 0x17c   :  { %2817 = vmatpush3.bf16.msra.mxu1 %v2814_v38  ;;  %v455_v38 = vld [vmem:[%s3278_s19 + $0x10] sm:$0xff]  ;;  %2855 = vmatprep.subr.bf16.mxu0 %v2854_v37  ;;  %s3826_s19 = sld [smem:[#allocation16_spill]] }
 0x17d   :  { %2819 = vmatprep.subr.bf16.mxu1 %v2818_v41  ;;  %2857 = vmatpush3.bf16.msra.mxu0 %v2854_v37 }
 0x17e   :  { %2859 = vmatprep.subr.bf16.mxu0 %v2858_v43 }
 0x180   :  { %2821 = vmatpush3.bf16.msra.mxu1 %v2818_v41  ;;  %v2850_v41 = vpack.c.bf16 %v456_v39, %v455_v38  ;;  %v2436_v38 = vld [vmem:[%s3811_s5 + $0x1] ss:$0 sm:$0xff] }
 0x181   :  { %2823 = vmatprep.subr.bf16.mxu1 %v2822_v44  ;;  %2861 = vmatpush3.bf16.msra.mxu0 %v2858_v43 }
 0x184   :  { %2825 = vmatpush3.bf16.msra.mxu1 %v2822_v44 }
 0x185   :  { %2827 = vmatprep.subr.bf16.mxu1 %v2826_v47 }
 0x188   :  { %2829 = vmatpush3.bf16.msra.mxu1 %v2826_v47 }
 0x189   :  { %2831 = vmatprep.subr.bf16.mxu1 %v2830_v50 }
 0x18c   :  { %2833 = vmatpush3.bf16.msra.mxu1 %v2830_v50 }
 0x18d   :  { %2835 = vmatprep.subr.bf16.mxu1 %v2834_v53 }
 0x190   :  { %2837 = vmatpush3.bf16.msra.mxu1 %v2834_v53 }
 0x191   :  { %2839 = vmatprep.subr.bf16.mxu1 %v2838_v56 }
 0x194   :  { %2841 = vmatpush3.bf16.msra.mxu1 %v2838_v56 }
 0x195   :  { %2843 = vmatprep.subr.bf16.mxu1 %v2842_v59 }
 0x198   :  { %2845 = vmatpush3.bf16.msra.mxu1 %v2842_v59 }
 0x199   :  { %2847 = vmatprep.subr.bf16.mxu1 %v2846_v35 }
 0x24e   :  { %v2613_v61 = vpop.f32.mrb[0].mxu1 }
 0x24f   :  { %v290_v62 = vadd.f32 %v2613_v61, %v2419_v60  ;;  %v284_v63 = vpop.f32.mrb[1].mxu1  ;;  %v897_v61 = vld [vmem:[%s3328_s27 + $0x8] sm:$0xff] }
 0x250   :  { %v285_v2 = vadd.f32 %v2419_v60, %v284_v63  ;;  %v896_v60 = vld [vmem:[%s3328_s27] sm:$0xff] }
 0x251   :  { %v2423_v3 = vmul.f32 -1.442695, %v290_v62  ;;  %v2862_v63 = vpack.c.bf16 %v897_v61, %v896_v60 }
 0x252   :  { %v2422_v4 = vmul.f32 -1.442695, %v285_v2 }
 0x253   :  { %3062 = vpow2.f32 %v2423_v3  ;;  %2863 = vmatprep.subr.bf16.mxu0 %v2862_v63 }
 0x254   :  { %3064 = vpow2.f32 %v2422_v4  ;;  %v2430_v4 = vld [vmem:[%s3293_s6] ss:$0 sm:$0xff]  ;;  %s3206_s6 = smov 120  }
 0x25d   :  { %v3063_v5 = vpop.eup %3062 }
 0x25e   :  { %v3065_v6 = vpop.eup %3064  ;;  %v300_v7 = vadd.f32 1.0, %v3063_v5 }
 0x25f   :  { %v299_v8 = vadd.f32 1.0, %v3065_v6 }
 0x260   :  { %3066 = vrcp.f32 %v300_v7 }
 0x261   :  { %3068 = vrcp.f32 %v299_v8 }
 0x26a   :  { %v3067_v9 = vpop.eup %3066 }
 0x26b   :  { %v3069_v10 = vpop.eup %3068  ;;  %v306_v12 = vmul.f32 %v3067_v9, %v290_v62  ;;  %v898_v62 = vld [vmem:[%s3328_s27 + $0x10] sm:$0xff] }
 0x26c   :  { %v305_v11 = vmul.f32 %v3069_v10, %v285_v2  ;;  %v899_v2 = vld [vmem:[%s3328_s27 + $0x18] sm:$0xff]  ;;  %s3829_s27 = sld [smem:[#allocation5_spill]] }
 0x26d   :  { %v2866_v3 = vpack.c.bf16 %v899_v2, %v898_v62 }
 0x26e   :  { %2646 = vmatprep.mubr.f32.mxu1 %v305_v11 }
 0x26f   :  { %2647 = vmatmul.mubr.f32.vlgmr.msra.gmra.mrb[2].mxu1 %v306_v12 }
 0x270   :  { %2849 = vmatpush3.bf16.msra.mxu1 %v2846_v35 }
 0x271   :  { %2851 = vmatprep.subr.bf16.mxu1 %v2850_v41 }
 0x274   :  { %2853 = vmatpush3.bf16.msra.mxu1 %v2850_v41 }
 0x342   :  { %v2648_v14 = vpop.f32.mrb[2].mxu1 }
 0x343   :  { %v402_v15 = vadd.f32 %v2648_v14, %v2424_v13  ;;  %v396_v16 = vpop.f32.mrb[3].mxu1 }
 0x344   :  { %v397_v17 = vadd.f32 %v2424_v13, %v396_v16  ;;  %v645_v13 = vlaneseq }
 0x345   :  { %v406_v18 = vmul.f32 0.5, %v402_v15 }
 0x346   :  { %v405_v19 = vmul.f32 0.5, %v397_v17  ;;  %v3483_v15 = vshrl.u32 %v645_v13, 7 }
 0x347   :  { %v3451_v20 = vadd.f32 %v406_v18, %v3414_v1 }
 0x348   :  { %v3454_v21 = vadd.f32 %v405_v19, %v3411_v0  ;;  %v647_v19 = vadd.s32 8, %v3483_v15  ;;  %vm674_vm1 = vcmp.lt.s32.totalorder %v3483_v15, 3  ;;  %vm698_vm2 = vcmp.lt.s32.totalorder %v3483_v15, 2 }
 0x349   :  { %v414_v22 = vsel %vm3790_vm0, %v3451_v20, 0.0  ;;  %vm724_vm3 = vcmp.lt.s32.totalorder %v3483_v15, 1  ;;  %vm759_vm8 = vcmp.lt.s32.totalorder %v3483_v15, 7  ;;  %vm785_vm13 = vcmp.lt.s32.totalorder %v3483_v15, 6 }
 0x34a   :  { %415 = vadd.xlane.f32.xlu1 %v414_v22  ;;  %v411_v23 = vsel %vm3790_vm0, %v3454_v21, 0.0  ;;  %v3487_v22 = vand.u32 7, %v3483_v15 }
 0x34b   :  { %412 = vadd.xlane.f32.xlu0 %v411_v23  ;;  %v3489_v23 = vand.u32 7, %v647_v19 }
 0x34c   :  { %vm677_vm4 = vcmp.ge.s32.totalorder %v3487_v22, 3  ;;  %vm701_vm6 = vcmp.ge.s32.totalorder %v3487_v22, 2  ;;  %vm727_vm9 = vcmp.ge.s32.totalorder %v3487_v22, 1  ;;  %vm764_vm11 = vcmp.lt.s32.totalorder %v3487_v22, 7 }
 0x34d   :  { %vm678_vm5 = vcmp.ge.s32.totalorder %v3489_v23, 3  ;;  %vm702_vm7 = vcmp.ge.s32.totalorder %v3489_v23, 2  ;;  %vm728_vm10 = vcmp.ge.s32.totalorder %v3489_v23, 1  ;;  %vm765_vm12 = vcmp.lt.s32.totalorder %v3489_v23, 7 }
 0x34e   :  { %vm790_vm14 = vcmp.lt.s32.totalorder %v3487_v22, 6  ;;  %vm791_vm15 = vcmp.lt.s32.totalorder %v3489_v23, 6 }
 0x3d7   :  { %v416_v24 = vpop.xlane.xlu1 %415 }
 0x3d8   :  { %v418_v25 = vmul.f32 0.03125, %v416_v24  ;;  %v413_v26 = vpop.xlane.xlu0 %412  ;;  %v2427_v24 = vld [vmem:[%s3283_s24] ss:$0 sm:$0xff]  ;;  %s3204_s24 = smov 88  }
 0x3d9   :  { %v417_v1 = vmul.f32 0.03125, %v413_v26 }
 0x3da   :  { %v420_v0 = vsub.f32 %v3451_v20, %v418_v25  ;;  %v853_v25 = vld [vmem:[%s3810_s0] sm:$0x1]  ;;  %s3833_s0 = sld [smem:[#allocation18_spill]] }
 0x3db   :  { %v419_v27 = vsub.f32 %v3454_v21, %v417_v1  ;;  %v854_v1 = vadd.f32 1e-05, %v853_v25 }
 0x3dc   :  { %v422_v28 = vmul.f32 %v420_v0, %v420_v0 }
 0x3dd   :  { %v421_v29 = vmul.f32 %v419_v27, %v419_v27 }
 0x3de   :  { %v426_v30 = vsel %vm3790_vm0, %v422_v28, 0.0 }
 0x3df   :  { %427 = vadd.xlane.f32.xlu1 %v426_v30  ;;  %v423_v31 = vsel %vm3790_vm0, %v421_v29, 0.0 }
 0x3e0   :  { %424 = vadd.xlane.f32.xlu0 %v423_v31 }
 0x46c   :  { %v428_v44 = vpop.xlane.xlu1 %427 }
 0x46d   :  { %v430_v45 = vmul.f32 0.03125, %v428_v44  ;;  %v425_v46 = vpop.xlane.xlu0 %424 }
 0x46e   :  { %v429_v47 = vmul.f32 0.03125, %v425_v46 }
 0x46f   :  { %v432_v48 = vadd.f32 1e-05, %v430_v45 }
 0x470   :  { %v431_v49 = vadd.f32 1e-05, %v429_v47 }
 0x471   :  { %3070 = vrsqrt.f32 %v432_v48 }
 0x472   :  { %3072 = vrsqrt.f32 %v431_v49 }
 0x47b   :  { %v3071_v50 = vpop.eup %3070 }
 0x47c   :  { %v3073_v52 = vpop.eup %3072  ;;  %v436_v53 = vmul.f32 %v3071_v50, %v420_v0 }
 0x47d   :  { %v435_v54 = vmul.f32 %v3073_v52, %v419_v27 }
 0x47e   :  { %v444_v56 = vmul.f32 %v2425_v51, %v436_v53 }
 0x47f   :  { %v443_v57 = vmul.f32 %v2425_v51, %v435_v54 }
 0x480   :  { %v452_v59 = vadd.f32 %v2426_v55, %v444_v56  ;;  %v2438_v56 = vld [vmem:[%s3811_s5 + $0x3] ss:$0 sm:$0xff] }
 0x481   :  { %v451_v58 = vadd.f32 %v2426_v55, %v443_v57  ;;  %v2437_v55 = vld [vmem:[%s3811_s5 + $0x2] ss:$0 sm:$0xff] }
 0x483   :  { %2657 = vmatprep.mubr.msk.f32.mxu1 %vm3790_vm0, %v451_v58  ;;  %2668 = vmatprep.mubr.msk.f32.mxu0 %vm3790_vm0, %v451_v58 }
 0x484   :  { %2658 = vmatmul.mubr.msk.f32.vlgmr.msra.gmra.mrb[4].mxu1 %vm3790_vm0, %v452_v59  ;;  %2669 = vmatmul.mubr.msk.f32.vlgmr.msra.gmra.mrb[0].mxu0 %vm3790_vm0, %v452_v59  ;;  %vm811_vm0 = vcmp.lt.s32.totalorder %v3483_v15, 5 }
 0x485   :  { %2865 = vmatpush3.bf16.msra.mxu0 %v2862_v63 }
 0x486   :  { %2867 = vmatprep.subr.bf16.mxu0 %v2866_v3 }
 0x489   :  { %2869 = vmatpush3.bf16.msra.mxu0 %v2866_v3 }
 0x557   :  { %v2659_v5 = vpop.f32.mrb[4].mxu1  ;;  %v2670_v6 = vpop.f32.mrb[0].mxu0 }
 0x558   :  { %v628_v7 = vadd.f32 %v2670_v6, %v2430_v4  ;;  %v536_v8 = vpop.f32.mrb[5].mxu1  ;;  %v622_v9 = vpop.f32.mrb[1].mxu0  ;;  %v542_v26 = vadd.f32 %v2659_v5, %v2427_v24 }
 0x559   :  { %v623_v10 = vadd.f32 %v2430_v4, %v622_v9  ;;  %v537_v27 = vadd.f32 %v2427_v24, %v536_v8  ;;  %v2439_v9 = vld [vmem:[%s3811_s5 + $0x4] ss:$0 sm:$0xff] }
 0x55a   :  { %v2434_v11 = vmul.f32 -1.442695, %v628_v7 }
 0x55b   :  { %v2433_v12 = vmul.f32 -1.442695, %v623_v10 }
 0x55c   :  { %3074 = vpow2.f32 %v2434_v11 }
 0x55d   :  { %3076 = vpow2.f32 %v2433_v12 }
 0x566   :  { %v3075_v14 = vpop.eup %3074 }
 0x567   :  { %v3077_v16 = vpop.eup %3076  ;;  %v638_v17 = vadd.f32 1.0, %v3075_v14 }
 0x568   :  { %v637_v18 = vadd.f32 1.0, %v3077_v16 }
 0x569   :  { %3078 = vrcp.f32 %v638_v17 }
 0x56a   :  { %3080 = vrcp.f32 %v637_v18  ;;  %v2440_v18 = vld [vmem:[%s3811_s5 + $0x5] ss:$0 sm:$0xff] }
 0x56b   :  { %3082 = vrsqrt.f32 %v854_v1 }
 0x573   :  { %v3079_v0 = vpop.eup %3078 }
 0x574   :  { %v3081_v28 = vpop.eup %3080  ;;  %v3501_v29 = vmul.f32 %v3079_v0, %v542_v26 }
 0x575   :  { %v3506_v30 = vmul.f32 %v3081_v28, %v537_v27  ;;  %v3083_v12 = vpop.eup %3082 }
 0x576   :  { %v673_v31 = vrot.slane %v3501_v29, 5  ;;  %v697_v32 = vrot.slane %v3501_v29, 6  ;;  %v723_v37 = vrot.slane %v3501_v29, 7  ;;  %v758_v40 = vrot.slane %v3501_v29, 1 }
 0x577   :  { %v672_v33 = vrot.slane %v3506_v30, 5  ;;  %v696_v35 = vrot.slane %v3506_v30, 6  ;;  %v722_v36 = vrot.slane %v3506_v30, 7  ;;  %v757_v39 = vrot.slane %v3506_v30, 1 }
 0x578   :  { %v783_v41 = vrot.slane %v3506_v30, 2  ;;  %v784_v42 = vrot.slane %v3501_v29, 2  ;;  %v753_v5 = vmul.f32 %v2438_v56, %v3506_v30  ;;  %v754_v6 = vmul.f32 %v2438_v56, %v3501_v29 }
 0x579   :  { %v675_v43 = vsel %vm674_vm1, %v672_v33, %v673_v31  ;;  %v676_v44 = vsel %vm674_vm1, %v673_v31, %v672_v33  ;;  %v699_v45 = vsel %vm698_vm2, %v696_v35, %v697_v32  ;;  %v700_v46 = vsel %vm698_vm2, %v697_v32, %v696_v35  ;;  %v2441_v32 = vld [vmem:[%s3811_s5 + $0x6] ss:$0 sm:$0xff]  ;;  %s3837_s5 = sld [smem:[#allocation21_spill]] }
 0x57a   :  { %v687_v47 = vsel %vm677_vm4, %v676_v44, 0.0  ;;  %v688_v48 = vsel %vm678_vm5, %v675_v43, 0.0  ;;  %v711_v49 = vsel %vm701_vm6, %v700_v46, 0.0  ;;  %v712_v50 = vsel %vm702_vm7, %v699_v45, 0.0 }
 0x57b   :  { %v694_v51 = vmul.f32 %v2435_v34, %v687_v47  ;;  %v695_v52 = vmul.f32 %v2435_v34, %v688_v48  ;;  %v718_v53 = vmul.f32 %v2436_v38, %v711_v49  ;;  %v719_v54 = vmul.f32 %v2436_v38, %v712_v50  ;;  %v2444_v48 = vld [vmem:[%s3814_s21] ss:$0 sm:$0xff]  ;;  %s3842_s21 = sld [smem:[#allocation23_spill]] }
 0x57c   :  { %v725_v57 = vsel %vm724_vm3, %v722_v36, %v723_v37  ;;  %v726_v58 = vsel %vm724_vm3, %v723_v37, %v722_v36  ;;  %v760_v59 = vsel %vm759_vm8, %v757_v39, %v758_v40  ;;  %v761_v60 = vsel %vm759_vm8, %v758_v40, %v757_v39  ;;  %v2442_v39 = vld [vmem:[%s3812_s13] ss:$0 sm:$0xff]  ;;  %s3840_s13 = sld [smem:[#allocation19_spill]] }
 0x57d   :  { %v720_v61 = vadd.f32 %v718_v53, %v694_v51  ;;  %v721_v62 = vadd.f32 %v719_v54, %v695_v52  ;;  %v737_v63 = vsel %vm727_vm9, %v726_v58, 0.0  ;;  %v738_v2 = vsel %vm728_vm10, %v725_v57, 0.0  ;;  %v2445_v51 = vld [vmem:[%s3815_s25] ss:$0 sm:$0xff]  ;;  %s3845_s25 = sld [smem:[#allocation22_spill]] }
 0x57e   :  { %v744_v3 = vmul.f32 %v2437_v55, %v737_v63  ;;  %v745_v4 = vmul.f32 %v2437_v55, %v738_v2  ;;  %v772_v7 = vsel %vm764_vm11, %v760_v59, 0.0  ;;  %v773_v8 = vsel %vm765_vm12, %v761_v60, 0.0 }
 0x57f   :  { %v786_v10 = vsel %vm785_vm13, %v783_v41, %v784_v42  ;;  %v787_v11 = vsel %vm785_vm13, %v784_v42, %v783_v41  ;;  %v809_v19 = vrot.slane %v3506_v30, 3  ;;  %v810_v24 = vrot.slane %v3501_v29, 3  ;;  %v2443_v42 = vld [vmem:[%s3813_s17] ss:$0 sm:$0xff]  ;;  %s3841_s17 = sld [smem:[#allocation20_spill]] }
 0x580   :  { %v746_v13 = vadd.f32 %v744_v3, %v720_v61  ;;  %v747_v14 = vadd.f32 %v745_v4, %v721_v62  ;;  %v798_v16 = vsel %vm790_vm14, %v786_v10, 0.0  ;;  %v799_v17 = vsel %vm791_vm15, %v787_v11, 0.0  ;;  %v2448_v3 = vld [vmem:[%s3816_s29] ss:$0 sm:$0xff] }
 0x581   :  { %vm816_vm1 = vcmp.lt.s32.totalorder %v3487_v22, 5  ;;  %vm817_vm2 = vcmp.lt.s32.totalorder %v3489_v23, 5  ;;  %v779_v1 = vmul.f32 %v2439_v9, %v772_v7  ;;  %v780_v0 = vmul.f32 %v2439_v9, %v773_v8 }
 0x582   :  { %v755_v25 = vadd.f32 %v753_v5, %v746_v13  ;;  %v756_v26 = vadd.f32 %v754_v6, %v747_v14  ;;  %v805_v27 = vmul.f32 %v2440_v18, %v798_v16  ;;  %v806_v28 = vmul.f32 %v2440_v18, %v799_v17 }
 0x583   :  { %v812_v31 = vsel %vm811_vm0, %v809_v19, %v810_v24  ;;  %v813_v30 = vsel %vm811_vm0, %v810_v24, %v809_v19  ;;  %v859_v34 = vsub.s32 0, %v3483_v15  ;;  %vm3817_vm0 = vcmask 261120  }
 0x584   :  { %v781_v29 = vadd.f32 %v779_v1, %v755_v25  ;;  %v782_v33 = vadd.f32 %v780_v0, %v756_v26  ;;  %v824_v22 = vsel %vm816_vm1, %v812_v31, 0.0  ;;  %v825_v23 = vsel %vm817_vm2, %v813_v30, 0.0  ;;  %vm3818_vm3 = vmmov %vm3817_vm0  ;;  %v1034_v25 = vld [vmem:[%s3820_s3] sm:$0xff]  ;;  %v1035_v26 = vld [vmem:[%s3820_s3 + $0x8] sm:$0xff] }
 0x585   :  { %v831_v37 = vmul.f32 %v2441_v32, %v824_v22  ;;  %v832_v38 = vmul.f32 %v2441_v32, %v825_v23  ;;  %v860_v45 = vrot.slane %v3083_v12, %v859_v34  ;;  %vm3819_vm4 = vmmov %vm3817_vm0  ;;  %v1036_v1 = vld [vmem:[%s3820_s3 + $0x10] sm:$0xff]  ;;  %v2870_v0 = vpack.c.bf16 %v1035_v26, %v1034_v25  ;;  %v2451_v34 = vld [vmem:[%s3824_s8] ss:$0 sm:$0xff] }
 0x586   :  { %v807_v35 = vadd.f32 %v805_v27, %v781_v29  ;;  %v808_v36 = vadd.f32 %v806_v28, %v782_v33  ;;  %vm3821_vm5 = vmmov %vm3817_vm0  ;;  %v1037_v27 = vld [vmem:[%s3820_s3 + $0x18] sm:$0xff]  ;;  %vm1132_vm10 = vcmask 64512   ;;  %vm1220_vm12 = vcmask 130048  }
 0x587   :  { %vm3822_vm6 = vmmov %vm3817_vm0  ;;  %v2874_v28 = vpack.c.bf16 %v1037_v27, %v1036_v1  ;;  %2871 = vmatprep.subr.bf16.mxu0 %v2870_v0  ;;  %vm1970_vm13 = vcmask 195584  }
 0x588   :  { %v833_v40 = vadd.f32 %v831_v37, %v807_v35  ;;  %v834_v41 = vadd.f32 %v832_v38, %v808_v36  ;;  %vm3823_vm7 = vmmov %vm3817_vm0  ;;  %v2452_v38 = vld [vmem:[%s3825_s14] ss:$0 sm:$0xff] }
 0x589   :  { %vm3827_vm8 = vmmov %vm3817_vm0 }
 0x58a   :  { %v842_v43 = vadd.f32 %v2442_v39, %v833_v40  ;;  %v843_v44 = vadd.f32 %v2442_v39, %v834_v41  ;;  %vm3828_vm9 = vmmov %vm3817_vm0 }
 0x58b   :  { %vm3627_vm11 = vmpackc.low %vm1132_vm10, %vm1132_vm10 }
 0x58c   :  { %v851_v46 = vsub.f32 %v842_v43, %v2443_v42  ;;  %v852_v47 = vsub.f32 %v843_v44, %v2443_v42  ;;  %v2453_v43 = vld [vmem:[%s3826_s19] ss:$0 sm:$0xff]  ;;  %vm3834_vm14 = vmmov %vm3817_vm0 }
 0x58d   :  { %vm3835_vm15 = vmmov %vm3817_vm0 }
 0x58e   :  { %v862_v49 = vmul.f32 %v860_v45, %v851_v46  ;;  %v863_v50 = vmul.f32 %v860_v45, %v852_v47  ;;  %vm3836_vm1 = vmmov %vm3817_vm0 }
 0x58f   :  { %vm3838_vm2 = vmmov %vm3817_vm0 }
 0x590   :  { %v871_v52 = vmul.f32 %v2444_v48, %v862_v49  ;;  %v872_v15 = vmul.f32 %v2444_v48, %v863_v50 }
 0x592   :  { %v880_v53 = vadd.f32 %v2445_v51, %v871_v52  ;;  %v881_v54 = vadd.f32 %v2445_v51, %v872_v15 }
 0x594   :  { %v2446_v55 = vmul.f32 -1.442695, %v880_v53  ;;  %v2447_v56 = vmul.f32 -1.442695, %v881_v54 }
 0x596   :  { %3084 = vpow2.f32 %v2446_v55 }
 0x597   :  { %3086 = vpow2.f32 %v2447_v56 }
 0x5a0   :  { %v3085_v57 = vpop.eup %3084 }
 0x5a1   :  { %v3087_v58 = vpop.eup %3086  ;;  %v888_v59 = vadd.f32 1.0, %v3085_v57 }
 0x5a2   :  { %v889_v60 = vadd.f32 1.0, %v3087_v58 }
 0x5a3   :  { %3088 = vrcp.f32 %v888_v59 }
 0x5a4   :  { %3090 = vrcp.f32 %v889_v60  ;;  %v3644_v60 = vld [vmem:[%s3829_s27 + $0x8] sm:$0xff] }
 0x5ad   :  { %v3089_v61 = vpop.eup %3088 }
 0x5ae   :  { %v3091_v62 = vpop.eup %3090  ;;  %v894_v63 = vmul.f32 %v3089_v61, %v880_v53 }
 0x5af   :  { %v895_v2 = vmul.f32 %v3091_v62, %v881_v54 }
 0x5b0   :  { %2679 = vmatprep.mubr.msk.f32.mxu0 %vm3817_vm0, %v894_v63  ;;  %v3647_v63 = vld [vmem:[%s3829_s27] sm:$0xff] }
 0x5b1   :  { %2680 = vmatmul.mubr.msk.f32.vlgmr.msra.gmra.mrb[2].mxu0 %vm3818_vm3, %v895_v2  ;;  %vm3839_vm3 = vmmov %vm3817_vm0 }
 0x5b2   :  { %2873 = vmatpush3.bf16.msra.mxu0 %v2870_v0 }
 0x5b3   :  { %2875 = vmatprep.subr.bf16.mxu0 %v2874_v28 }
 0x5b6   :  { %2877 = vmatpush3.bf16.msra.mxu0 %v2874_v28 }
 0x684   :  { %v2681_v4 = vpop.f32.mrb[2].mxu0 }
 0x685   :  { %v985_v5 = vadd.f32 %v2681_v4, %v2448_v3  ;;  %v979_v6 = vpop.f32.mrb[3].mxu0 }
 0x686   :  { %v980_v7 = vadd.f32 %v2448_v3, %v979_v6 }
 0x687   :  { %v3589_v8 = vadd.f32 %v985_v5, %v3451_v20 }
 0x688   :  { %v3592_v9 = vadd.f32 %v980_v7, %v3454_v21 }
 0x689   :  { %v995_v10 = vsel %vm3819_vm4, %v3589_v8, 0.0  ;;  %vm3843_vm4 = vmmov %vm3817_vm0 }
 0x68a   :  { %996 = vadd.xlane.f32.xlu1 %v995_v10  ;;  %v992_v11 = vsel %vm3821_vm5, %v3592_v9, 0.0  ;;  %vm3844_vm5 = vmmov %vm3817_vm0 }
 0x68b   :  { %993 = vadd.xlane.f32.xlu0 %v992_v11 }
 0x717   :  { %v997_v12 = vpop.xlane.xlu1 %996 }
 0x718   :  { %v999_v13 = vmul.f32 0.03125, %v997_v12  ;;  %v994_v14 = vpop.xlane.xlu0 %993 }
 0x719   :  { %v998_v20 = vmul.f32 0.03125, %v994_v14 }
 0x71a   :  { %v1001_v16 = vsub.f32 %v3589_v8, %v999_v13 }
 0x71b   :  { %v1000_v21 = vsub.f32 %v3592_v9, %v998_v20 }
 0x71c   :  { %v1003_v17 = vmul.f32 %v1001_v16, %v1001_v16 }
 0x71d   :  { %v1002_v18 = vmul.f32 %v1000_v21, %v1000_v21 }
 0x71e   :  { %v1007_v19 = vsel %vm3822_vm6, %v1003_v17, 0.0  ;;  %vm3846_vm6 = vmmov %vm3817_vm0 }
 0x71f   :  { %1008 = vadd.xlane.f32.xlu1 %v1007_v19  ;;  %v1004_v24 = vsel %vm3823_vm7, %v1002_v18, 0.0  ;;  %vm3847_vm7 = vmmov %vm3817_vm0 }
 0x720   :  { %1005 = vadd.xlane.f32.xlu0 %v1004_v24 }
 0x7ac   :  { %v1009_v31 = vpop.xlane.xlu1 %1008 }
 0x7ad   :  { %v1011_v30 = vmul.f32 0.03125, %v1009_v31  ;;  %v1006_v32 = vpop.xlane.xlu0 %1005 }
 0x7ae   :  { %v1010_v29 = vmul.f32 0.03125, %v1006_v32 }
 0x7af   :  { %v1013_v33 = vadd.f32 1e-05, %v1011_v30 }
 0x7b0   :  { %v1012_v22 = vadd.f32 1e-05, %v1010_v29 }
 0x7b1   :  { %3092 = vrsqrt.f32 %v1013_v33 }
 0x7b2   :  { %3094 = vrsqrt.f32 %v1012_v22 }
 0x7bb   :  { %v3093_v23 = vpop.eup %3092 }
 0x7bc   :  { %v3095_v35 = vpop.eup %3094  ;;  %v1017_v36 = vmul.f32 %v3093_v23, %v1001_v16 }
 0x7bd   :  { %v1016_v37 = vmul.f32 %v3095_v35, %v1000_v21 }
 0x7be   :  { %v1025_v39 = vmul.f32 %v2451_v34, %v1017_v36 }
 0x7bf   :  { %v1024_v40 = vmul.f32 %v2451_v34, %v1016_v37 }
 0x7c0   :  { %v1033_v42 = vadd.f32 %v2452_v38, %v1025_v39 }
 0x7c1   :  { %v1032_v41 = vadd.f32 %v2452_v38, %v1024_v40 }
 0x7c3   :  { %2690 = vmatprep.mubr.msk.f32.mxu0 %vm3827_vm8, %v1032_v41  ;;  %vm3848_vm8 = vmmov %vm3817_vm0 }
 0x7c4   :  { %2691 = vmatmul.mubr.msk.f32.vlgmr.msra.gmra.mrb[4].mxu0 %vm3828_vm9, %v1033_v42  ;;  %vm3849_vm9 = vmmov %vm3817_vm0 }
 0x897   :  { %v2692_v44 = vpop.f32.mrb[4].mxu0 }
 0x898   :  { %v3611_v45 = vadd.f32 %v2692_v44, %v2453_v43  ;;  %v1117_v46 = vpop.f32.mrb[5].mxu0 }
 0x899   :  { %v3613_v47 = vadd.f32 %v2453_v43, %v1117_v46 }
 0x89b   :  { %2697 = vmatprep.mubr.msk.f32.mxu1 %vm1132_vm10, %v3613_v47  ;;  %v3619_v48 = vpack.i.bf16 %v3611_v45, %v3613_v47 }
 0x89d   :  { %3024 = vrot.lane.b32.xlu1 %v3619_v48, %s3204_s24  ;;  %3019 = vrot.lane.b32.xlu0 %v3619_v48, %s3205_s30 }
 0x8a1   :  { %1330 = vrot.lane.b32.xlu1 %v3613_v47, %s3206_s6 }
 0x8a5   :  { %1332 = vrot.lane.b32.xlu1 %v3611_v45, %s3206_s6 }
 0x90f   :  { %v3025_v49 = vpop.permute.xlu1 %3024  ;;  %v3020_v50 = vpop.permute.xlu0 %3019 }
 0x910   :  { %v3027_v51 = vunpack.i.h.bf16 %v3025_v49  ;;  %v3026_v52 = vunpack.i.l.bf16 %v3025_v49  ;;  %v3022_v15 = vunpack.i.h.bf16 %v3020_v50  ;;  %v3021_v53 = vunpack.i.l.bf16 %v3020_v50 }
 0x912   :  { %v2878_v55 = vpack.c.bf16 %v3022_v15, %v3021_v53  ;;  %v2888_v56 = vpack.c.bf16 %v3027_v51, %v3026_v52 }
 0x913   :  { %v1331_v57 = vpop.permute.xlu1 %1330 }
 0x914   :  { %2880 = vmatprep.subr.msk.bf16.mxu1 %vm3627_vm11, %v2878_v55 }
 0x915   :  { %2883 = vmatpush3.bf16.xpose.msk.msra.mxu1 %vm3627_vm11, %v2878_v55 }
 0x916   :  { %2890 = vmatprep.subr.msk.bf16.mxu1 %vm3627_vm11, %v2888_v56 }
 0x917   :  { %v1333_v58 = vpop.permute.xlu1 %1332 }
 0x91c   :  { %2698 = vmatmul.mubr.msk.f32.vlgmr.msra.gmra.mrb[6].mxu1 %vm1132_vm10, %v3611_v45 }
 0x91d   :  { %2893 = vmatpush3.bf16.xpose.msk.msra.mxu1 %vm3627_vm11, %v2888_v56  ;;  %2711 = vmatprep.mubr.msk.f32.mxu1 %vm1132_vm10, %v1331_v57 }
 0x924   :  { %2712 = vmatmul.mubr.msk.f32.vlgmr.msra.gmra.mrb[8].mxu1 %vm1132_vm10, %v1333_v58 }
 0x9ef   :  { %v2699_v59 = vpop.f32.mrb[6].mxu1 }
 0x9f0   :  { %v1217_v61 = vmul.f32 0.35355338, %v2699_v59  ;;  %v1207_v62 = vpop.f32.mrb[7].mxu1 }
 0x9f1   :  { %v1216_v2 = vmul.f32 0.35355338, %v1207_v62 }
 0x9f2   :  { %v1219_v3 = vadd.f32 %v1217_v61, %v3644_v60 }
 0x9f3   :  { %v1218_v4 = vadd.f32 %v1216_v2, %v3647_v63 }
 0x9f4   :  { %v1224_v5 = vsel %vm1220_vm12, %v1219_v3, -inf }
 0x9f5   :  { %1225 = vmax.xlane.f32.xlu1 %v1224_v5  ;;  %v1221_v6 = vsel %vm1220_vm12, %v1218_v4, -inf }
 0x9f6   :  { %1222 = vmax.xlane.f32.xlu0 %v1221_v6 }
 0x9f7   :  { %v2713_v7 = vpop.f32.mrb[8].mxu1 }
 0x9f8   :  { %v1412_v10 = vpop.f32.mrb[9].mxu1  ;;  %v1422_v11 = vmul.f32 0.35355338, %v2713_v7 }
 0x9f9   :  { %v1421_v12 = vmul.f32 0.35355338, %v1412_v10 }
 0x9fa   :  { %v1424_v20 = vadd.f32 %v1422_v11, %v3644_v60 }
 0x9fb   :  { %v1423_v13 = vadd.f32 %v1421_v12, %v3647_v63 }
 0x9fc   :  { %v1428_v16 = vsel %vm1220_vm12, %v1424_v20, -inf }
 0x9fd   :  { %v1425_v14 = vsel %vm1220_vm12, %v1423_v13, -inf }
 0x9fe   :  { %1426 = vmax.xlane.f32.xlu0 %v1425_v14 }
 0xa02   :  { %1429 = vmax.xlane.f32.xlu0 %v1428_v16 }
 0xa82   :  { %v1226_v21 = vpop.xlane.xlu1 %1225 }
 0xa83   :  { %v1228_v17 = vsub.f32 %v1219_v3, %v1226_v21  ;;  %v1223_v18 = vpop.xlane.xlu0 %1222 }
 0xa84   :  { %v1227_v19 = vsub.f32 %v1218_v4, %v1223_v18 }
 0xa85   :  { %v1231_v24 = vmul.f32 1.442695, %v1228_v17 }
 0xa86   :  { %v1229_v25 = vmul.f32 1.442695, %v1227_v19 }
 0xa87   :  { %3096 = vpow2.f32 %v1231_v24 }
 0xa88   :  { %3098 = vpow2.f32 %v1229_v25 }
 0xa8b   :  { %v1427_v26 = vpop.xlane.xlu0 %1426 }
 0xa8c   :  { %v1431_v1 = vsub.f32 %v1423_v13, %v1427_v26 }
 0xa8e   :  { %v1433_v0 = vmul.f32 1.442695, %v1431_v1 }
 0xa8f   :  { %v1430_v27 = vpop.xlane.xlu0 %1429 }
 0xa90   :  { %3100 = vpow2.f32 %v1433_v0  ;;  %v1432_v28 = vsub.f32 %v1424_v20, %v1430_v27 }
 0xa91   :  { %v3097_v31 = vpop.eup %3096 }
 0xa92   :  { %v3099_v30 = vpop.eup %3098  ;;  %v1435_v32 = vmul.f32 1.442695, %v1432_v28  ;;  %v1236_v29 = vsel %vm1220_vm12, %v3097_v31, 0.0 }
 0xa93   :  { %1237 = vadd.xlane.f32.xlu1 %v1236_v29  ;;  %v1233_v33 = vsel %vm1220_vm12, %v3099_v30, 0.0 }
 0xa94   :  { %3102 = vpow2.f32 %v1435_v32  ;;  %1234 = vadd.xlane.f32.xlu0 %v1233_v33 }
 0xa9a   :  { %v3101_v22 = vpop.eup %3100 }
 0xa9b   :  { %v1437_v23 = vsel %vm1220_vm12, %v3101_v22, 0.0 }
 0xa9c   :  { %1438 = vadd.xlane.f32.xlu0 %v1437_v23 }
 0xa9e   :  { %v3103_v34 = vpop.eup %3102 }
 0xa9f   :  { %v1440_v35 = vsel %vm1220_vm12, %v3103_v34, 0.0 }
 0xaa0   :  { %1441 = vadd.xlane.f32.xlu1 %v1440_v35 }
 0xab1   :  { %3034 = vrot.lane.b32.xlu1 %v3619_v48, %s3207_s28 }
 0xab2   :  { %3029 = vrot.lane.b32.xlu0 %v3619_v48, %s3208_s1 }
 0xab5   :  { %3039 = vrot.lane.b32.xlu1 %v3619_v48, %s3209_s2 }
 0xab6   :  { %1536 = vrot.lane.b32.xlu0 %v3611_v45, %s3210_s7 }
 0xab9   :  { %1534 = vrot.lane.b32.xlu1 %v3613_v47, %s3210_s7 }
 0xb20   :  { %v1238_v37 = vpop.xlane.xlu1 %1237 }
 0xb21   :  { %v1235_v36 = vpop.xlane.xlu0 %1234 }
 0xb22   :  { %3104 = vrcp.f32 %v1235_v36 }
 0xb23   :  { %3106 = vrcp.f32 %v1238_v37 }
 0xb29   :  { %v1439_v38 = vpop.xlane.xlu0 %1438 }
 0xb2a   :  { %3108 = vrcp.f32 %v1439_v38 }
 0xb2c   :  { %v3105_v39 = vpop.eup %3104 }
 0xb2d   :  { %v1442_v40 = vpop.xlane.xlu1 %1441  ;;  %v3030_v41 = vpop.permute.xlu0 %3029  ;;  %v1241_v42 = vmul.f32 %v3105_v39, %v3099_v30 }
 0xb2e   :  { %3110 = vrcp.f32 %v1442_v40  ;;  %v3032_v43 = vunpack.i.h.bf16 %v3030_v41  ;;  %v3031_v44 = vunpack.i.l.bf16 %v3030_v41  ;;  %v3107_v49 = vpop.eup %3106 }
 0xb2f   :  { %2704 = vmatprep.mubr.msk.f32.mxu0 %vm1220_vm12, %v1241_v42  ;;  %v1242_v53 = vmul.f32 %v3107_v49, %v3097_v31 }
 0xb30   :  { %v2884_v46 = vpack.c.bf16 %v3032_v43, %v3031_v44 }
 0xb31   :  { %v3035_v50 = vpop.permute.xlu1 %3034  ;;  %v1537_v4 = vpop.permute.xlu0 %1536 }
 0xb32   :  { %v3037_v51 = vunpack.i.h.bf16 %v3035_v50  ;;  %v3036_v52 = vunpack.i.l.bf16 %v3035_v50  ;;  %2885 = vmatprep.subr.bf16.mxu0 %v2884_v46 }
 0xb33   :  { %2887 = vmatpush3.bf16.msra.mxu0 %v2884_v46 }
 0xb34   :  { %v3109_v15 = vpop.eup %3108  ;;  %v2894_v55 = vpack.c.bf16 %v3037_v51, %v3036_v52 }
 0xb35   :  { %v3040_v56 = vpop.permute.xlu1 %3039  ;;  %v1445_v57 = vmul.f32 %v3109_v15, %v3101_v22 }
 0xb36   :  { %v3042_v58 = vunpack.i.h.bf16 %v3040_v56  ;;  %v3041_v59 = vunpack.i.l.bf16 %v3040_v56  ;;  %2705 = vmatmul.mubr.msk.f32.vlgmr.msra.gmra.mrb[6].mxu0 %vm1220_vm12, %v1242_v53  ;;  %2895 = vmatprep.subr.bf16.mxu0 %v2894_v55 }
 0xb37   :  { %2897 = vmatpush3.bf16.msra.mxu0 %v2894_v55  ;;  %2718 = vmatprep.mubr.msk.f32.mxu0 %vm1220_vm12, %v1445_v57 }
 0xb38   :  { %v3111_v61 = vpop.eup %3110  ;;  %v2898_v62 = vpack.c.bf16 %v3042_v58, %v3041_v59 }
 0xb39   :  { %v1446_v2 = vmul.f32 %v3111_v61, %v3103_v34  ;;  %v1535_v3 = vpop.permute.xlu1 %1534 }
 0xb3a   :  { %2900 = vmatprep.subr.msk.bf16.mxu0 %vm3627_vm11, %v2898_v62 }
 0xb3b   :  { %2719 = vmatmul.mubr.msk.f32.vlgmr.msra.gmra.mrb[8].mxu0 %vm1220_vm12, %v1446_v2 }
 0xb3c   :  { %2725 = vmatprep.mubr.msk.f32.mxu0 %vm1132_vm10, %v1535_v3 }
 0xb40   :  { %2903 = vmatpush3.bf16.xpose.msk.msra.mxu0 %vm3627_vm11, %v2898_v62 }
 0xb47   :  { %2726 = vmatmul.mubr.msk.f32.vlgmr.msra.gmra.mrb[10].mxu0 %vm1132_vm10, %v1537_v4 }
 0xc09   :  { %v3676_v5 = vpop.f32.mrb[6].mxu0 }
 0xc0a   :  { %v3678_v6 = vpop.f32.mrb[7].mxu0 }
 0xc0e   :  { %v3680_v7 = vpop.f32.mrb[8].mxu0 }
 0xc0f   :  { %v3682_v10 = vpop.f32.mrb[9].mxu0 }
 0xc1a   :  { %v2727_v11 = vpop.f32.mrb[10].mxu0 }
 0xc1b   :  { %v1626_v12 = vmul.f32 0.35355338, %v2727_v11  ;;  %v1616_v13 = vpop.f32.mrb[11].mxu0 }
 0xc1c   :  { %v1625_v14 = vmul.f32 0.35355338, %v1616_v13 }
 0xc1d   :  { %v1628_v20 = vadd.f32 %v1626_v12, %v3644_v60 }
 0xc1e   :  { %v1627_v16 = vadd.f32 %v1625_v14, %v3647_v63 }
 0xc1f   :  { %v1632_v21 = vsel %vm1220_vm12, %v1628_v20, -inf }
 0xc20   :  { %1633 = vmax.xlane.f32.xlu0 %v1632_v21  ;;  %v1629_v17 = vsel %vm1220_vm12, %v1627_v16, -inf  ;;  %v1974_v21 = vld [vmem:[%s3832_s23 + $0x8] sm:$0xff] }
 0xc21   :  { %1630 = vmax.xlane.f32.xlu1 %v1629_v17  ;;  %v1975_v17 = vld [vmem:[%s3832_s23 + $0x10] sm:$0xff] }
 0xc32   :  { %3044 = vrot.lane.b32.xlu1 %v3619_v48, %s3211_s10 }
 0xc36   :  { %1738 = vrot.lane.b32.xlu1 %v3613_v47, %s3212_s11 }
 0xc3a   :  { %1740 = vrot.lane.b32.xlu1 %v3611_v45, %s3212_s11 }
 0xcad   :  { %v1634_v18 = vpop.xlane.xlu0 %1633 }
 0xcae   :  { %v1636_v19 = vsub.f32 %v1628_v20, %v1634_v18  ;;  %v1631_v24 = vpop.xlane.xlu1 %1630 }
 0xcaf   :  { %v1635_v25 = vsub.f32 %v1627_v16, %v1631_v24  ;;  %v1973_v16 = vld [vmem:[%s3832_s23] sm:$0xff] }
 0xcb0   :  { %v1639_v26 = vmul.f32 1.442695, %v1636_v19  ;;  %v2918_v18 = vpack.c.bf16 %v1974_v21, %v1973_v16  ;;  %v1976_v19 = vld [vmem:[%s3832_s23 + $0x18] sm:$0xff]  ;;  %v2219_v16 = vld [vmem:[%s3842_s21 + $0x10] sm:$0xff] }
 0xcb1   :  { %v1637_v1 = vmul.f32 1.442695, %v1635_v25  ;;  %v2922_v24 = vpack.c.bf16 %v1976_v19, %v1975_v17  ;;  %v2220_v21 = vld [vmem:[%s3842_s21 + $0x18] sm:$0xff]  ;;  %v2222_v19 = vld [vmem:[%s3842_s21 + $0x28] sm:$0xff] }
 0xcb2   :  { %3112 = vpow2.f32 %v1639_v26  ;;  %v3045_v0 = vpop.permute.xlu1 %3044  ;;  %v2938_v17 = vpack.c.bf16 %v2220_v21, %v2219_v16  ;;  %v2491_v16 = vld [vmem:[%s3398_s9] ss:$0 sm:$0xff] }
 0xcb3   :  { %v3047_v27 = vunpack.i.h.bf16 %v3045_v0  ;;  %v3046_v28 = vunpack.i.l.bf16 %v3045_v0  ;;  %3114 = vpow2.f32 %v1637_v1 }
 0xcb5   :  { %v2904_v31 = vpack.c.bf16 %v3047_v27, %v3046_v28 }
 0xcb6   :  { %v1739_v40 = vpop.permute.xlu1 %1738 }
 0xcb7   :  { %2905 = vmatprep.subr.bf16.mxu1 %v2904_v31 }
 0xcb8   :  { %2907 = vmatpush3.bf16.msra.mxu1 %v2904_v31 }
 0xcba   :  { %v1741_v41 = vpop.permute.xlu1 %1740 }
 0xcbc   :  { %v3113_v30 = vpop.eup %3112 }
 0xcbd   :  { %v1644_v32 = vsel %vm1220_vm12, %v3113_v30, 0.0  ;;  %v3115_v47 = vpop.eup %3114 }
 0xcbe   :  { %1645 = vadd.xlane.f32.xlu0 %v1644_v32  ;;  %v1641_v45 = vsel %vm1220_vm12, %v3115_v47, 0.0 }
 0xcc2   :  { %1642 = vadd.xlane.f32.xlu0 %v1641_v45 }
 0xcd8   :  { %3049 = vrot.lane.b32.xlu0 %v3619_v48, %s3213_s15 }
 0xd4b   :  { %v1646_v29 = vpop.xlane.xlu0 %1645 }
 0xd4c   :  { %3116 = vrcp.f32 %v1646_v29 }
 0xd4f   :  { %v1643_v33 = vpop.xlane.xlu0 %1642 }
 0xd50   :  { %3118 = vrcp.f32 %v1643_v33 }
 0xd53   :  { %v3050_v22 = vpop.permute.xlu0 %3049 }
 0xd54   :  { %v3052_v23 = vunpack.i.h.bf16 %v3050_v22  ;;  %v3051_v34 = vunpack.i.l.bf16 %v3050_v22  ;;  %v2480_v22 = vld [vmem:[%s3833_s0] ss:$0 sm:$0xff] }
 0xd56   :  { %v2908_v35 = vpack.c.bf16 %v3052_v23, %v3051_v34  ;;  %v3117_v36 = vpop.eup %3116 }
 0xd57   :  { %v1650_v39 = vmul.f32 %v3117_v36, %v3113_v30 }
 0xd58   :  { %2910 = vmatprep.subr.msk.bf16.mxu1 %vm3627_vm11, %v2908_v35 }
 0xd5a   :  { %v3119_v37 = vpop.eup %3118 }
 0xd5b   :  { %v1649_v38 = vmul.f32 %v3119_v37, %v3115_v47 }
 0xd5d   :  { %2732 = vmatprep.mubr.msk.f32.mxu1 %vm1220_vm12, %v1649_v38 }
 0xd5e   :  { %2733 = vmatmul.mubr.msk.f32.vlgmr.msra.gmra.mrb[10].mxu1 %vm1220_vm12, %v1650_v39 }
 0xd5f   :  { %2913 = vmatpush3.bf16.xpose.msk.msra.mxu1 %vm3627_vm11, %v2908_v35  ;;  %2739 = vmatprep.mubr.msk.f32.mxu1 %vm1132_vm10, %v1739_v40  ;;  %vm3851_vm11 = vmmov %vm3817_vm0 }
 0xd66   :  { %2740 = vmatmul.mubr.msk.f32.vlgmr.msra.gmra.mrb[12].mxu1 %vm1132_vm10, %v1741_v41 }
 0xe31   :  { %v2734_v42 = vpop.f32.mrb[10].mxu1 }
 0xe32   :  { %v1729_v43 = vpop.f32.mrb[11].mxu1 }
 0xe39   :  { %v2741_v44 = vpop.f32.mrb[12].mxu1 }
 0xe3a   :  { %v1830_v46 = vmul.f32 0.35355338, %v2741_v44  ;;  %v1820_v49 = vpop.f32.mrb[13].mxu1 }
 0xe3b   :  { %v1829_v50 = vmul.f32 0.35355338, %v1820_v49 }
 0xe3c   :  { %v1832_v51 = vadd.f32 %v1830_v46, %v3644_v60 }
 0xe3d   :  { %v1831_v52 = vadd.f32 %v1829_v50, %v3647_v63  ;;  %v2111_v50 = vld [vmem:[%s3837_s5] sm:$0xff] }
 0xe3e   :  { %v1836_v15 = vsel %vm1220_vm12, %v1832_v51, -inf }
 0xe3f   :  { %1837 = vmax.xlane.f32.xlu0 %v1836_v15  ;;  %v1833_v54 = vsel %vm1220_vm12, %v1831_v52, -inf }
 0xe40   :  { %1834 = vmax.xlane.f32.xlu1 %v1833_v54  ;;  %v2114_v54 = vld [vmem:[%s3837_s5 + $0x18] sm:$0xff] }
 0xe51   :  { %3054 = vrot.lane.b32.xlu1 %v3619_v48, %s3214_s16 }
 0xe55   :  { %1946 = vrot.lane.b32.xlu1 %v3680_v7, %s3215_s18 }
 0xe59   :  { %1952 = vrot.lane.b32.xlu1 %v1729_v43, %s3216_s22 }
 0xe5d   :  { %1954 = vrot.lane.b32.xlu1 %v2734_v42, %s3216_s22 }
 0xecc   :  { %v1838_v53 = vpop.xlane.xlu0 %1837 }
 0xecd   :  { %v1840_v60 = vsub.f32 %v1832_v51, %v1838_v53  ;;  %v1835_v55 = vpop.xlane.xlu1 %1834  ;;  %v2112_v51 = vld [vmem:[%s3837_s5 + $0x8] sm:$0xff] }
 0xece   :  { %v1839_v63 = vsub.f32 %v1831_v52, %v1835_v55  ;;  %v2113_v52 = vld [vmem:[%s3837_s5 + $0x10] sm:$0xff]  ;;  %v2926_v15 = vpack.c.bf16 %v2112_v51, %v2111_v50 }
 0xecf   :  { %v1843_v56 = vmul.f32 1.442695, %v1840_v60  ;;  %v2930_v53 = vpack.c.bf16 %v2114_v54, %v2113_v52 }
 0xed0   :  { %v1841_v57 = vmul.f32 1.442695, %v1839_v63  ;;  %2927 = vmatprep.subr.bf16.mxu1 %v2926_v15 }
 0xed1   :  { %v3055_v58 = vpop.permute.xlu1 %3054  ;;  %2929 = vmatpush3.bf16.msra.mxu1 %v2926_v15 }
 0xed2   :  { %3120 = vpow2.f32 %v1841_v57  ;;  %v3057_v59 = vunpack.i.h.bf16 %v3055_v58  ;;  %v3056_v61 = vunpack.i.l.bf16 %v3055_v58  ;;  %2931 = vmatprep.subr.bf16.mxu1 %v2930_v53 }
 0xed3   :  { %3122 = vpow2.f32 %v1843_v56 }
 0xed4   :  { %v2914_v62 = vpack.c.bf16 %v3057_v59, %v3056_v61  ;;  %v2483_v61 = vld [vmem:[%s3840_s13] ss:$0 sm:$0xff] }
 0xed5   :  { %v1947_v26 = vpop.permute.xlu1 %1946  ;;  %2933 = vmatpush3.bf16.msra.mxu1 %v2930_v53 }
 0xed6   :  { %2915 = vmatprep.subr.bf16.mxu0 %v2914_v62  ;;  %v1967_v30 = vsel %vm1132_vm10, %v3676_v5, %v1947_v26 }
 0xed7   :  { %2917 = vmatpush3.bf16.msra.mxu0 %v2914_v62 }
 0xed8   :  { %2919 = vmatprep.subr.bf16.mxu0 %v2918_v18 }
 0xed9   :  { %v1953_v1 = vpop.permute.xlu1 %1952 }
 0xedc   :  { %v3121_v48 = vpop.eup %3120 }
 0xedd   :  { %v1845_v2 = vsel %vm1220_vm12, %v3121_v48, 0.0  ;;  %v3123_v3 = vpop.eup %3122  ;;  %v1955_v27 = vpop.permute.xlu1 %1954 }
 0xede   :  { %1846 = vadd.xlane.f32.xlu0 %v1845_v2  ;;  %v1848_v4 = vsel %vm1220_vm12, %v3123_v3, 0.0  ;;  %v1969_v45 = vsel %vm1220_vm12, %v1967_v30, %v1955_v27 }
 0xee2   :  { %1849 = vadd.xlane.f32.xlu0 %v1848_v4 }
 0xef8   :  { %1944 = vrot.lane.b32.xlu0 %v3682_v10, %s3215_s18 }
 0xf6b   :  { %v1847_v7 = vpop.xlane.xlu0 %1846 }
 0xf6c   :  { %3124 = vrcp.f32 %v1847_v7 }
 0xf6f   :  { %v1850_v11 = vpop.xlane.xlu0 %1849 }
 0xf70   :  { %3126 = vrcp.f32 %v1850_v11 }
 0xf73   :  { %v1945_v0 = vpop.permute.xlu0 %1944 }
 0xf74   :  { %v1966_v28 = vsel %vm1132_vm10, %v3678_v6, %v1945_v0  ;;  %v2226_v0 = vld [vmem:[%s3842_s21 + $0x48] sm:$0xff]  ;;  %vm3850_vm10 = vmmov %vm3817_vm0 }
 0xf75   :  { %v1968_v32 = vsel %vm1220_vm12, %v1966_v28, %v1953_v1  ;;  %v2225_v1 = vld [vmem:[%s3842_s21 + $0x40] sm:$0xff]  ;;  %v2227_v28 = vld [vmem:[%s3842_s21 + $0x50] sm:$0xff] }
 0xf76   :  { %v3125_v12 = vpop.eup %3124  ;;  %v2950_v27 = vpack.c.bf16 %v2226_v0, %v2225_v1 }
 0xf77   :  { %v1853_v13 = vmul.f32 %v3125_v12, %v3121_v48  ;;  %v2484_v48 = vld [vmem:[%s3841_s17] ss:$0 sm:$0xff] }
 0xf79   :  { %2746 = vmatprep.mubr.msk.f32.mxu0 %vm1220_vm12, %v1853_v13  ;;  %v2217_v13 = vld [vmem:[%s3842_s21] sm:$0xff] }
 0xf7a   :  { %v3127_v14 = vpop.eup %3126 }
 0xf7b   :  { %v1854_v20 = vmul.f32 %v3127_v14, %v3123_v3  ;;  %v2218_v14 = vld [vmem:[%s3842_s21 + $0x8] sm:$0xff] }
 0xf7d   :  { %2747 = vmatmul.mubr.msk.f32.vlgmr.msra.gmra.mrb[12].mxu0 %vm1220_vm12, %v1854_v20  ;;  %v2934_v20 = vpack.c.bf16 %v2218_v14, %v2217_v13 }
 0xf7e   :  { %2921 = vmatpush3.bf16.msra.mxu0 %v2918_v18  ;;  %v2221_v18 = vld [vmem:[%s3842_s21 + $0x20] sm:$0xff] }
 0xf7f   :  { %2923 = vmatprep.subr.bf16.mxu0 %v2922_v24 }
 0xf82   :  { %2925 = vmatpush3.bf16.msra.mxu0 %v2922_v24  ;;  %v2942_v24 = vpack.c.bf16 %v2222_v19, %v2221_v18  ;;  %v2492_v19 = vld [vmem:[%s3403_s12] ss:$0 sm:$0xff] }
 0xf83   :  { %2935 = vmatprep.subr.bf16.mxu0 %v2934_v20 }
0x1050   :  { %v2748_v10 = vpop.f32.mrb[12].mxu0 }
0x1051   :  { %1962 = vrot.lane.b32.xlu1 %v2748_v10, %s3217_s26  ;;  %v1933_v25 = vpop.f32.mrb[13].mxu0  ;;  %v2223_v10 = vld [vmem:[%s3842_s21 + $0x30] sm:$0xff] }
0x1052   :  { %1960 = vrot.lane.b32.xlu0 %v1933_v25, %s3217_s26  ;;  %v2224_v25 = vld [vmem:[%s3842_s21 + $0x38] sm:$0xff] }
0x1053   :  { %v2946_v26 = vpack.c.bf16 %v2224_v25, %v2223_v10 }
0x10c3   :  { %v1963_v31 = vpop.permute.xlu1 %1962 }
0x10c4   :  { %v1961_v47 = vpop.permute.xlu0 %1960  ;;  %v1972_v33 = vsel %vm1970_vm13, %v1969_v45, %v1963_v31  ;;  %v2228_v31 = vld [vmem:[%s3842_s21 + $0x58] sm:$0xff]  ;;  %v2231_v45 = vld [vmem:[%s3842_s21 + $0x70] sm:$0xff] }
0x10c5   :  { %v1971_v29 = vsel %vm1970_vm13, %v1968_v32, %v1961_v47  ;;  %v2954_v30 = vpack.c.bf16 %v2228_v31, %v2227_v28  ;;  %v2229_v32 = vld [vmem:[%s3842_s21 + $0x60] sm:$0xff]  ;;  %v2230_v47 = vld [vmem:[%s3842_s21 + $0x68] sm:$0xff] }
0x10c6   :  { %2757 = vmatprep.mubr.msk.f32.mxu0 %vm3834_vm14, %v1971_v29  ;;  %v2958_v29 = vpack.c.bf16 %v2230_v47, %v2229_v32 }
0x10c7   :  { %2758 = vmatmul.mubr.msk.f32.vlgmr.msra.gmra.mrb[14].mxu0 %vm3835_vm15, %v1972_v33  ;;  %v2232_v33 = vld [vmem:[%s3842_s21 + $0x78] sm:$0xff] }
0x10c8   :  { %2937 = vmatpush3.bf16.msra.mxu0 %v2934_v20 }
0x10c9   :  { %2939 = vmatprep.subr.bf16.mxu0 %v2938_v17 }
0x10cc   :  { %2941 = vmatpush3.bf16.msra.mxu0 %v2938_v17 }
0x10cd   :  { %2943 = vmatprep.subr.bf16.mxu0 %v2942_v24 }
0x10d0   :  { %2945 = vmatpush3.bf16.msra.mxu0 %v2942_v24 }
0x10d1   :  { %2947 = vmatprep.subr.bf16.mxu0 %v2946_v26 }
0x10d4   :  { %2949 = vmatpush3.bf16.msra.mxu0 %v2946_v26 }
0x10d5   :  { %2951 = vmatprep.subr.bf16.mxu0 %v2950_v27 }
0x10d8   :  { %2953 = vmatpush3.bf16.msra.mxu0 %v2950_v27 }
0x10d9   :  { %2955 = vmatprep.subr.bf16.mxu0 %v2954_v30 }
0x10dc   :  { %2957 = vmatpush3.bf16.msra.mxu0 %v2954_v30 }
0x10dd   :  { %2959 = vmatprep.subr.bf16.mxu0 %v2958_v29 }
0x10e0   :  { %2961 = vmatpush3.bf16.msra.mxu0 %v2958_v29 }
0x119a   :  { %v2759_v23 = vpop.f32.mrb[14].mxu0 }
0x119b   :  { %v2062_v34 = vadd.f32 %v2759_v23, %v2480_v22  ;;  %v2056_v6 = vpop.f32.mrb[15].mxu0  ;;  %v2485_v23 = vld [vmem:[%s3845_s25] ss:$0 sm:$0xff] }
0x119c   :  { %v2057_v35 = vadd.f32 %v2480_v22, %v2056_v6  ;;  %v2962_v22 = vpack.c.bf16 %v2232_v33, %v2231_v45 }
0x119d   :  { %v3729_v36 = vadd.f32 %v2062_v34, %v3589_v8 }
0x119e   :  { %v3732_v5 = vadd.f32 %v2057_v35, %v3592_v9  ;;  %2963 = vmatprep.subr.bf16.mxu0 %v2962_v22 }
0x119f   :  { %v2072_v37 = vsel %vm3836_vm1, %v3729_v36, 0.0  ;;  %2965 = vmatpush3.bf16.msra.mxu0 %v2962_v22 }
0x11a0   :  { %2073 = vadd.xlane.f32.xlu1 %v2072_v37  ;;  %v2069_v38 = vsel %vm3838_vm2, %v3732_v5, 0.0 }
0x11a1   :  { %2070 = vadd.xlane.f32.xlu0 %v2069_v38 }
0x122d   :  { %v2074_v39 = vpop.xlane.xlu1 %2073 }
0x122e   :  { %v2076_v40 = vmul.f32 0.03125, %v2074_v39  ;;  %v2071_v41 = vpop.xlane.xlu0 %2070 }
0x122f   :  { %v2075_v8 = vmul.f32 0.03125, %v2071_v41 }
0x1230   :  { %v2078_v42 = vsub.f32 %v3729_v36, %v2076_v40 }
0x1231   :  { %v2077_v9 = vsub.f32 %v3732_v5, %v2075_v8 }
0x1232   :  { %v2080_v46 = vmul.f32 %v2078_v42, %v2078_v42 }
0x1233   :  { %v2079_v43 = vmul.f32 %v2077_v9, %v2077_v9 }
0x1234   :  { %v2084_v49 = vsel %vm3839_vm3, %v2080_v46, 0.0 }
0x1235   :  { %v2081_v44 = vsel %vm3817_vm0, %v2079_v43, 0.0 }
0x1236   :  { %2082 = vadd.xlane.f32.xlu0 %v2081_v44 }
0x123a   :  { %2085 = vadd.xlane.f32.xlu0 %v2084_v49  ;;  %v2490_v49 = vld [vmem:[%s3393_s4] ss:$0 sm:$0xff]  ;;  %s3218_s4 = smov [#allocation2]  }
0x123b   :  { %s2370_s29 = sshll.u32 %s3218_s4, 4  ;;  %s2371_s29 = int_to_ptr.vmem [resolvable:$true] %s2370_s29 }
0x123c   :  { %s3144_s3 = scalar_lea.vmem %s2371_s29, 256  ;;  %p3149_p1 = scmp.lt.s32.totalorder %s2371_s29, %s2371_s29 }
0x123d   :  { %p3145_p0 = scmp.ne.s32.totalorder %s2371_s29, %s3144_s3  ;;  %p3150_p2 = scmp.lt.s32.totalorder %s3144_s3, %s3144_s3 }
0x123f   :  { %p3151_p3 = por %p3150_p2, %p3149_p1 }
0x1241   :  { %p3152_p4 = pnand %p3151_p3, %p3145_p0 }
0x12c3   :  { %v2083_v60 = vpop.xlane.xlu0 %2082 }
0x12c4   :  { %v2087_v55 = vmul.f32 0.03125, %v2083_v60 }
0x12c6   :  { %v2089_v63 = vadd.f32 1e-05, %v2087_v55 }
0x12c7   :  { %v2086_v56 = vpop.xlane.xlu0 %2085 }
0x12c8   :  { %3128 = vrsqrt.f32 %v2089_v63  ;;  %v2088_v57 = vmul.f32 0.03125, %v2086_v56 }
0x12ca   :  { %v2090_v58 = vadd.f32 1e-05, %v2088_v57 }
0x12cc   :  { %3130 = vrsqrt.f32 %v2090_v58 }
0x12d2   :  { %v3129_v59 = vpop.eup %3128 }
0x12d3   :  { %v2093_v62 = vmul.f32 %v3129_v59, %v2077_v9 }
0x12d5   :  { %v2101_v2 = vmul.f32 %v2483_v61, %v2093_v62 }
0x12d6   :  { %v3131_v3 = vpop.eup %3130 }
0x12d7   :  { %v2094_v4 = vmul.f32 %v3131_v3, %v2078_v42  ;;  %v2109_v7 = vadd.f32 %v2484_v48, %v2101_v2 }
0x12d9   :  { %v2102_v11 = vmul.f32 %v2483_v61, %v2094_v4  ;;  %2768 = vmatprep.mubr.msk.f32.mxu1 %vm3843_vm4, %v2109_v7 }
0x12db   :  { %v2110_v12 = vadd.f32 %v2484_v48, %v2102_v11 }
0x12dd   :  { %2769 = vmatmul.mubr.msk.f32.vlgmr.msra.gmra.mrb[14].mxu1 %vm3844_vm5, %v2110_v12 }
0x13b0   :  { %v2770_v34 = vpop.f32.mrb[14].mxu1 }
0x13b1   :  { %v2200_v6 = vadd.f32 %v2770_v34, %v2485_v23  ;;  %v2194_v35 = vpop.f32.mrb[15].mxu1 }
0x13b2   :  { %v2195_v37 = vadd.f32 %v2485_v23, %v2194_v35 }
0x13b3   :  { %v2489_v38 = vmul.f32 -1.442695, %v2200_v6 }
0x13b4   :  { %v2488_v39 = vmul.f32 -1.442695, %v2195_v37 }
0x13b5   :  { %3132 = vpow2.f32 %v2489_v38 }
0x13b6   :  { %3134 = vpow2.f32 %v2488_v39 }
0x13bf   :  { %v3133_v40 = vpop.eup %3132 }
0x13c0   :  { %v3135_v41 = vpop.eup %3134  ;;  %v2210_v8 = vadd.f32 1.0, %v3133_v40 }
0x13c1   :  { %v2209_v42 = vadd.f32 1.0, %v3135_v41 }
0x13c2   :  { %3136 = vrcp.f32 %v2210_v8 }
0x13c3   :  { %3138 = vrcp.f32 %v2209_v42 }
0x13cc   :  { %v3137_v9 = vpop.eup %3136 }
0x13cd   :  { %v3139_v43 = vpop.eup %3138  ;;  %v2216_v46 = vmul.f32 %v3137_v9, %v2200_v6 }
0x13ce   :  { %v2215_v44 = vmul.f32 %v3139_v43, %v2195_v37 }
0x13d0   :  { %2803 = vmatprep.mubr.f32.mxu0 %v2215_v44 }
0x13d1   :  { %2804 = vmatmul.mubr.f32.vlgmr.msra.gmra.mrb[16].mxu0 %v2216_v46 }
0x14a4   :  { %v2805_v50 = vpop.f32.mrb[16].mxu0 }
0x14a5   :  { %v2312_v51 = vadd.f32 %v2805_v50, %v2490_v49  ;;  %v2306_v52 = vpop.f32.mrb[17].mxu0 }
0x14a6   :  { %v2307_v15 = vadd.f32 %v2490_v49, %v2306_v52 }
0x14a7   :  { %v2316_v54 = vmul.f32 0.5, %v2312_v51 }
0x14a8   :  { %v2315_v53 = vmul.f32 0.5, %v2307_v15 }
0x14a9   :  { %v2318_v60 = vadd.f32 %v2316_v54, %v3729_v36 }
0x14aa   :  { %v2317_v55 = vadd.f32 %v2315_v53, %v3732_v5 }
0x14ab   :  { %v2324_v63 = vsel %vm3846_vm6, %v2318_v60, 0.0 }
0x14ac   :  { %2325 = vadd.xlane.f32.xlu1 %v2324_v63  ;;  %v2321_v56 = vsel %vm3847_vm7, %v2317_v55, 0.0 }
0x14ad   :  { %2322 = vadd.xlane.f32.xlu0 %v2321_v56 }
0x1539   :  { %v2326_v57 = vpop.xlane.xlu1 %2325 }
0x153a   :  { %v2328_v58 = vmul.f32 0.03125, %v2326_v57  ;;  %v2323_v59 = vpop.xlane.xlu0 %2322 }
0x153b   :  { %v2327_v61 = vmul.f32 0.03125, %v2323_v59 }
0x153c   :  { %v2330_v62 = vsub.f32 %v2318_v60, %v2328_v58 }
0x153d   :  { %v2329_v48 = vsub.f32 %v2317_v55, %v2327_v61 }
0x153e   :  { %v2332_v2 = vmul.f32 %v2330_v62, %v2330_v62 }
0x153f   :  { %v2331_v3 = vmul.f32 %v2329_v48, %v2329_v48 }
0x1540   :  { %v2336_v4 = vsel %vm3848_vm8, %v2332_v2, 0.0 }
0x1541   :  { %2337 = vadd.xlane.f32.xlu1 %v2336_v4  ;;  %v2333_v36 = vsel %vm3849_vm9, %v2331_v3, 0.0 }
0x1542   :  { %2334 = vadd.xlane.f32.xlu0 %v2333_v36 }
0x15ce   :  { %v2338_v5 = vpop.xlane.xlu1 %2337 }
0x15cf   :  { %v2340_v7 = vmul.f32 0.03125, %v2338_v5  ;;  %v2335_v11 = vpop.xlane.xlu0 %2334 }
0x15d0   :  { %v2339_v12 = vmul.f32 0.03125, %v2335_v11 }
0x15d1   :  { %v2342_v13 = vadd.f32 1e-05, %v2340_v7 }
0x15d2   :  { %v2341_v14 = vadd.f32 1e-05, %v2339_v12 }
0x15d3   :  { %3140 = vrsqrt.f32 %v2342_v13 }
0x15d4   :  { %3142 = vrsqrt.f32 %v2341_v14 }
0x15dd   :  { %v3141_v20 = vpop.eup %3140 }
0x15de   :  { %v3143_v21 = vpop.eup %3142  ;;  %v2346_v17 = vmul.f32 %v3141_v20, %v2330_v62 }
0x15df   :  { %v2345_v18 = vmul.f32 %v3143_v21, %v2329_v48 }
0x15e0   :  { %v2354_v24 = vmul.f32 %v2491_v16, %v2346_v17 }
0x15e1   :  { %v2353_v10 = vmul.f32 %v2491_v16, %v2345_v18 }
0x15e2   :  { %v2362_v25 = vadd.f32 %v2492_v19, %v2354_v24 }
0x15e3   :  { %v2361_v26 = vadd.f32 %v2492_v19, %v2353_v10 }
0x15e4   :  { %2364 = vst.msk [vmem:[#allocation2 + $0x8] sm:$0xff] %vm3850_vm10, %v2362_v25 }
0x15e5   :  { %2363 = vst.msk [vmem:[#allocation2] sm:$0xff] %vm3851_vm11, %v2361_v26 }
0x15e6   :  { %3155 = shalt.err (!%p3152_p4)
}
0x15e7   :  { %s3156_s9 = scalar_lea.hbm %s3408_s20, 256 }
0x15e8   :  { %p3157_p5 = scmp.ne.s32.totalorder %s3408_s20, %s3156_s9  ;;  %p3160_p6 = scmp.lt.u32.totalorder %s3156_s9, %s3408_s20 }
0x15ea   :  { %p3162_p7 = pnand %p3160_p6, %p3157_p5 }
0x15ec   :  { %3165 = shalt.err (!%p3162_p7)
}
0x15ed   :  { %s3219_s12 = smov 128  }
0x15ee   :  { %2376 = dma.vmem_to_hbm [thread:$0]  %s2371_s29, 256, %s3408_s20, [#allocation3], %s3219_s12, %s3219_s12, %s3215_s18  }
0x15ef   :  { %3166 = dma.done.wait [#allocation3], 256  }
0x15f0   :  { %3167 = vsyncadd [#allocation3], 4294967040 }
0x15f1   :  { %2380 = vsyncpa [#allocation3], 1 }

</bundles_post_ra>
